<compile_context>
chip_gen: v7x
topology: tpu7x:2x2x1
jax: 0.10.0
libtpu: 0.0.40
codegen_flags: <defaults>
</compile_context>

<pallas_src>
import math

import jax
import jax.numpy as jnp
from jax.experimental import pallas as pl
from jax.experimental.pallas import tpu as pltpu

_LANES = 128
_SUBLANES = 8


def _make_product_kernel(num_child_inputs):
    """Kernel body summing `num_child_inputs` gathered child tiles per step."""

    def kernel(idx_ref, *refs):
        # refs = (child_ref_0 .. child_ref_{K-1}, out_ref, acc_ref)
        del idx_ref  # consumed by the index_maps (scalar prefetch), not here
        child_refs = refs[:num_child_inputs]
        out_ref = refs[num_child_inputs]
        acc_ref = refs[num_child_inputs + 1]

        step = pl.program_id(1)  # reduction axis over child groups (last axis)

        @pl.when(step == 0)
        def _():
            acc_ref[...] = jnp.zeros_like(acc_ref)

        partial_sum = child_refs[0][...].astype(jnp.float32)
        for r in child_refs[1:]:
            partial_sum = partial_sum + r[...].astype(jnp.float32)
        acc_ref[...] += partial_sum

        @pl.when(step == pl.num_programs(1) - 1)
        def _():
            out_ref[...] = acc_ref[...].astype(out_ref.dtype)

    return kernel


def product_node_forward(
    function_values,
    children_indices,
    *,
    force_pallas=False,
    max_children_per_step=8,
    max_sublane_tile=256,
    small_problem_bytes=256 * 1024,
):
    """Pallas implementation of ProductNode.forward.

    function_values: (num_nodes, *rest) array.
    children_indices: 1-D int sequence (static length) of node indices.
    Returns an array of shape `rest` (sum over the gathered children).
    """
    function_values = jnp.asarray(function_values)
    num_nodes = function_values.shape[0]
    rest_shape = function_values.shape[1:]
    feat = math.prod(rest_shape) if rest_shape else 1

    idx = jnp.asarray(children_indices, dtype=jnp.int32).reshape(-1)
    n_children = int(idx.shape[0])

    # Empty child set: torch sums an empty dim-0 slice -> zeros.
    if n_children == 0:
        return jnp.zeros(rest_shape, dtype=function_values.dtype)

    # Normalize negative indices and clamp (guards against OOB block DMAs).
    idx = jnp.where(idx < 0, idx + num_nodes, idx)
    idx = jnp.clip(idx, 0, num_nodes - 1)

    # Fast path: for tiny gathers the pallas_call launch + per-step overhead
    # dwarfs the work; XLA's fused gather+reduce is strictly better.
    itemsize = int(function_values.dtype.itemsize)
    gathered_bytes = n_children * feat * itemsize
    if not force_pallas and gathered_bytes < small_problem_bytes:
        fv2 = function_values.reshape(num_nodes, feat)
        out = jnp.take(fv2, idx, axis=0).sum(axis=0)
        return out.reshape(rest_shape) if rest_shape else out[0]

    # ---------------------------- Pallas path ------------------------------
    # Lane/sublane-dense layout: (num_nodes, S, 128), S tiled along sublanes.
    s_full = -(-feat // _LANES)  # ceil(feat / 128)
    # dtype-aware sublane multiple (f32: 8, bf16: 16, int8/fp8: 32)
    sub_mult = _SUBLANES * max(1, 4 // max(1, itemsize))
    if s_full <= sub_mult:
        s_tile = s_full            # block covers the full dim -> always legal
        s_pad = s_full
    else:
        s_rounded = -(-s_full // sub_mult) * sub_mult
        tile_cap = max(sub_mult, (max_sublane_tile // sub_mult) * sub_mult)
        s_tile = min(s_rounded, tile_cap)
        s_pad = -(-s_rounded // s_tile) * s_tile
    feat_tiles = s_pad // s_tile
    total_feat = s_pad * _LANES

    # K children per grid step; pad the index table to a multiple of K with
    # the index of an appended all-zero row (identity in log space).
    k = min(max_children_per_step, n_children)
    n_steps = -(-n_children // k)
    n_idx_pad = n_steps * k
    needs_zero_row = n_idx_pad != n_children

    fv = function_values.reshape(num_nodes, feat)
    col_pad = total_feat - feat
    row_pad = 1 if needs_zero_row else 0
    if col_pad or row_pad:
        fv = jnp.pad(fv, ((0, row_pad), (0, col_pad)))
    fv3 = fv.reshape(num_nodes + row_pad, s_pad, _LANES)

    if needs_zero_row:
        pad_idx = jnp.full((n_idx_pad - n_children,), num_nodes, dtype=jnp.int32)
        idx = jnp.concatenate([idx, pad_idx])

    def make_child_index_map(kk):
        def index_map(f, j, idx_ref):
            # Data-dependent row gather: block index along dim 0 comes from
            # the scalar-prefetched children_indices table.
            return (idx_ref[j * k + kk], f, 0)

        return index_map

    in_specs = [
        pl.BlockSpec((1, s_tile, _LANES), make_child_index_map(kk))
        for kk in range(k)
    ]
    out_spec = pl.BlockSpec((1, s_tile, _LANES), lambda f, j, idx_ref: (0, f, 0))

    out = pl.pallas_call(
        _make_product_kernel(k),
        out_shape=jax.ShapeDtypeStruct((1, s_pad, _LANES), function_values.dtype),
        grid_spec=pltpu.PrefetchScalarGridSpec(
            num_scalar_prefetch=1,
            grid=(feat_tiles, n_steps),          # reduction axis last
            in_specs=in_specs,
            out_specs=out_spec,
            scratch_shapes=[pltpu.VMEM((1, s_tile, _LANES), jnp.float32)],
        ),
        compiler_params=pltpu.CompilerParams(
            dimension_semantics=("parallel", "arbitrary"),
            vmem_limit_bytes=32 * 1024 * 1024,   # safe on v5e/v6e/v7x
        ),
    )(idx, *([fv3] * k))

    result = out.reshape(total_feat)[:feat]
    return result.reshape(rest_shape) if rest_shape else result[0]


class ProductNode:
    """Thin Python wrapper mirroring the PyTorch module's interface."""

    def __init__(self, node_idx, scope, children_indices):
        self.node_idx = node_idx
        self.scope = scope
        self.children_indices = children_indices

    def __call__(self, function_values):
        return product_node_forward(function_values, self.children_indices)

    forward = __call__


if __name__ == "__main__":
    key = jax.random.PRNGKey(0)
    k1, k2 = jax.random.split(key)

    # ---- Test 1: exercise the Pallas kernel (K-way child grouping with a
    # padded index table + zero row, feature-axis tiling, negative index).
    num_nodes, batch, seq, hidden = 24, 4, 8, 40
    fv_big = jax.random.normal(k1, (num_nodes, batch, seq, hidden), dtype=jnp.float32)
    children = [1, 3, 4, 6, 7, 9, 12, 15, 18, 21, -1]  # 11 children, one negative

    out_pallas = product_node_forward(
        fv_big, children, force_pallas=True, max_sublane_tile=8)
    out_pallas = jax.block_until_ready(out_pallas)

    idx_norm = jnp.asarray([c % num_nodes for c in children], dtype=jnp.int32)
    ref_big = jnp.sum(fv_big[idx_norm], axis=0)
    assert out_pallas.shape == ref_big.shape, (out_pallas.shape, ref_big.shape)
    assert jnp.allclose(out_pallas, ref_big, atol=1e-5, rtol=1e-5)

    # ---- Test 2: bf16 inputs -> f32 scratch accumulation, single final cast.
    fv_bf16 = fv_big.astype(jnp.bfloat16)
    out_bf16 = jax.block_until_ready(
        product_node_forward(fv_bf16, children, force_pallas=True))
    ref_bf16 = jnp.sum(fv_bf16[idx_norm].astype(jnp.float32), axis=0).astype(jnp.bfloat16)
    assert out_bf16.dtype == jnp.bfloat16
    assert jnp.allclose(out_bf16.astype(jnp.float32), ref_bf16.astype(jnp.float32),
                        atol=2e-2, rtol=2e-2)

    # ---- Test 3: module-style wrapper + small-problem fast path (auto dispatch).
    fv_small = jax.random.normal(k2, (8, 2, 16), dtype=jnp.float32)
    node = ProductNode(node_idx=0, scope=[0, 1, 2], children_indices=[1, 3, 4, 6])
    out_small = jax.block_until_ready(node(fv_small))
    ref_small = jnp.sum(fv_small[jnp.asarray([1, 3, 4, 6])], axis=0)
    assert jnp.allclose(out_small, ref_small, atol=1e-5, rtol=1e-5)

    print("KERNEL_OK")
</pallas_src>

<mosaic_0001>
module attributes {stable_mosaic.version = 11 : i64} {
  func.func @kernel(%arg0: i32, %arg1: i32, %arg2: memref<16xi32, #tpu.memory_space<smem>>, %arg3: memref<1x8x128xf32, #tpu.memory_space<vmem>>, %arg4: memref<1x8x128xf32, #tpu.memory_space<vmem>>, %arg5: memref<1x8x128xf32, #tpu.memory_space<vmem>>, %arg6: memref<1x8x128xf32, #tpu.memory_space<vmem>>, %arg7: memref<1x8x128xf32, #tpu.memory_space<vmem>>, %arg8: memref<1x8x128xf32, #tpu.memory_space<vmem>>, %arg9: memref<1x8x128xf32, #tpu.memory_space<vmem>>, %arg10: memref<1x8x128xf32, #tpu.memory_space<vmem>>, %arg11: memref<1x8x128xf32, #tpu.memory_space<vmem>>, %arg12: memref<1x8x128xf32, #tpu.memory_space<vmem>>) attributes {dimension_semantics = [#tpu.dimension_semantics<parallel>, #tpu.dimension_semantics<arbitrary>], iteration_bounds = array<i64: 2, 2>, scalar_prefetch = 1 : i64, scratch_operands = 1 : i64, tpu.core_type = #tpu.core_type<tc>, window_params = [{transform_indices = @transform_0, window_bounds = array<i64: 1, 8, 128>}, {transform_indices = @transform_1, window_bounds = array<i64: 1, 8, 128>}, {transform_indices = @transform_2, window_bounds = array<i64: 1, 8, 128>}, {transform_indices = @transform_3, window_bounds = array<i64: 1, 8, 128>}, {transform_indices = @transform_4, window_bounds = array<i64: 1, 8, 128>}, {transform_indices = @transform_5, window_bounds = array<i64: 1, 8, 128>}, {transform_indices = @transform_6, window_bounds = array<i64: 1, 8, 128>}, {transform_indices = @transform_7, window_bounds = array<i64: 1, 8, 128>}, {transform_indices = @transform_8, window_bounds = array<i64: 1, 8, 128>}]} {
    %c0_i32 = arith.constant 0 : i32
    %0 = arith.cmpi eq, %arg1, %c0_i32 : i32
    %1 = arith.extui %0 : i1 to i32
    %c0_i32_0 = arith.constant 0 : i32
    %2 = arith.cmpi ne, %1, %c0_i32_0 : i32
    scf.if %2 {
      %cst = arith.constant 0.000000e+00 : f32
      %24 = vector.broadcast %cst : f32 to vector<1x8x128xf32>
      %c0_31 = arith.constant 0 : index
      %c0_32 = arith.constant 0 : index
      %c0_33 = arith.constant 0 : index
      %25 = vector.load %arg12[%c0_31, %c0_32, %c0_33] : memref<1x8x128xf32, #tpu.memory_space<vmem>>, vector<1x8x128xf32>
      tpu.vector_store %arg12[%c0_31, %c0_32, %c0_33], %24 {strides = array<i32>} : memref<1x8x128xf32, #tpu.memory_space<vmem>>, vector<1x8x128xf32>,
    } else {
    }
    %c0 = arith.constant 0 : index
    %c0_1 = arith.constant 0 : index
    %c0_2 = arith.constant 0 : index
    %3 = vector.load %arg3[%c0, %c0_1, %c0_2] : memref<1x8x128xf32, #tpu.memory_space<vmem>>, vector<1x8x128xf32>
    %c0_3 = arith.constant 0 : index
    %c0_4 = arith.constant 0 : index
    %c0_5 = arith.constant 0 : index
    %4 = vector.load %arg4[%c0_3, %c0_4, %c0_5] : memref<1x8x128xf32, #tpu.memory_space<vmem>>, vector<1x8x128xf32>
    %5 = arith.addf %3, %4 : vector<1x8x128xf32>
    %c0_6 = arith.constant 0 : index
    %c0_7 = arith.constant 0 : index
    %c0_8 = arith.constant 0 : index
    %6 = vector.load %arg5[%c0_6, %c0_7, %c0_8] : memref<1x8x128xf32, #tpu.memory_space<vmem>>, vector<1x8x128xf32>
    %7 = arith.addf %5, %6 : vector<1x8x128xf32>
    %c0_9 = arith.constant 0 : index
    %c0_10 = arith.constant 0 : index
    %c0_11 = arith.constant 0 : index
    %8 = vector.load %arg6[%c0_9, %c0_10, %c0_11] : memref<1x8x128xf32, #tpu.memory_space<vmem>>, vector<1x8x128xf32>
    %9 = arith.addf %7, %8 : vector<1x8x128xf32>
    %c0_12 = arith.constant 0 : index
    %c0_13 = arith.constant 0 : index
    %c0_14 = arith.constant 0 : index
    %10 = vector.load %arg7[%c0_12, %c0_13, %c0_14] : memref<1x8x128xf32, #tpu.memory_space<vmem>>, vector<1x8x128xf32>
    %11 = arith.addf %9, %10 : vector<1x8x128xf32>
    %c0_15 = arith.constant 0 : index
    %c0_16 = arith.constant 0 : index
    %c0_17 = arith.constant 0 : index
    %12 = vector.load %arg8[%c0_15, %c0_16, %c0_17] : memref<1x8x128xf32, #tpu.memory_space<vmem>>, vector<1x8x128xf32>
    %13 = arith.addf %11, %12 : vector<1x8x128xf32>
    %c0_18 = arith.constant 0 : index
    %c0_19 = arith.constant 0 : index
    %c0_20 = arith.constant 0 : index
    %14 = vector.load %arg9[%c0_18, %c0_19, %c0_20] : memref<1x8x128xf32, #tpu.memory_space<vmem>>, vector<1x8x128xf32>
    %15 = arith.addf %13, %14 : vector<1x8x128xf32>
    %c0_21 = arith.constant 0 : index
    %c0_22 = arith.constant 0 : index
    %c0_23 = arith.constant 0 : index
    %16 = vector.load %arg10[%c0_21, %c0_22, %c0_23] : memref<1x8x128xf32, #tpu.memory_space<vmem>>, vector<1x8x128xf32>
    %17 = arith.addf %15, %16 : vector<1x8x128xf32>
    %c0_24 = arith.constant 0 : index
    %c0_25 = arith.constant 0 : index
    %c0_26 = arith.constant 0 : index
    %18 = vector.load %arg12[%c0_24, %c0_25, %c0_26] : memref<1x8x128xf32, #tpu.memory_space<vmem>>, vector<1x8x128xf32>
    %19 = arith.addf %18, %17 : vector<1x8x128xf32>
    %c0_27 = arith.constant 0 : index
    %c0_28 = arith.constant 0 : index
    %c0_29 = arith.constant 0 : index
    %20 = vector.load %arg12[%c0_27, %c0_28, %c0_29] : memref<1x8x128xf32, #tpu.memory_space<vmem>>, vector<1x8x128xf32>
    tpu.vector_store %arg12[%c0_27, %c0_28, %c0_29], %19 {strides = array<i32>} : memref<1x8x128xf32, #tpu.memory_space<vmem>>, vector<1x8x128xf32>,
    %c1_i32 = arith.constant 1 : i32
    %21 = arith.cmpi eq, %arg1, %c1_i32 : i32
    %22 = arith.extui %21 : i1 to i32
    %c0_i32_30 = arith.constant 0 : i32
    %23 = arith.cmpi ne, %22, %c0_i32_30 : i32
    scf.if %23 {
      %c0_31 = arith.constant 0 : index
      %c0_32 = arith.constant 0 : index
      %c0_33 = arith.constant 0 : index
      %24 = vector.load %arg12[%c0_31, %c0_32, %c0_33] : memref<1x8x128xf32, #tpu.memory_space<vmem>>, vector<1x8x128xf32>
      %c0_34 = arith.constant 0 : index
      %c0_35 = arith.constant 0 : index
      %c0_36 = arith.constant 0 : index
      %25 = vector.load %arg11[%c0_34, %c0_35, %c0_36] : memref<1x8x128xf32, #tpu.memory_space<vmem>>, vector<1x8x128xf32>
      tpu.vector_store %arg11[%c0_34, %c0_35, %c0_36], %24 {strides = array<i32>} : memref<1x8x128xf32, #tpu.memory_space<vmem>>, vector<1x8x128xf32>,
    } else {
    }
    return
  }
  func.func @transform_0(%arg0: i32, %arg1: i32, %arg2: memref<16xi32, #tpu.memory_space<smem>>) -> (i32, i32, i32) {
    %c8_i32 = arith.constant 8 : i32
    %0 = arith.muli %arg1, %c8_i32 : i32
    %c0_i32 = arith.constant 0 : i32
    %1 = arith.addi %0, %c0_i32 : i32
    %2 = arith.index_cast %1 : i32 to index
    %3 = memref.load %arg2[%2] : memref<16xi32, #tpu.memory_space<smem>>
    %c0_i32_0 = arith.constant 0 : i32
    %c0_i32_1 = arith.constant 0 : i32
    return %3, %arg0, %c0_i32_0 : i32, i32, i32
  }
  func.func @transform_1(%arg0: i32, %arg1: i32, %arg2: memref<16xi32, #tpu.memory_space<smem>>) -> (i32, i32, i32) {
    %c8_i32 = arith.constant 8 : i32
    %0 = arith.muli %arg1, %c8_i32 : i32
    %c1_i32 = arith.constant 1 : i32
    %1 = arith.addi %0, %c1_i32 : i32
    %2 = arith.index_cast %1 : i32 to index
    %3 = memref.load %arg2[%2] : memref<16xi32, #tpu.memory_space<smem>>
    %c0_i32 = arith.constant 0 : i32
    %c0_i32_0 = arith.constant 0 : i32
    return %3, %arg0, %c0_i32 : i32, i32, i32
  }
  func.func @transform_2(%arg0: i32, %arg1: i32, %arg2: memref<16xi32, #tpu.memory_space<smem>>) -> (i32, i32, i32) {
    %c8_i32 = arith.constant 8 : i32
    %0 = arith.muli %arg1, %c8_i32 : i32
    %c2_i32 = arith.constant 2 : i32
    %1 = arith.addi %0, %c2_i32 : i32
    %2 = arith.index_cast %1 : i32 to index
    %3 = memref.load %arg2[%2] : memref<16xi32, #tpu.memory_space<smem>>
    %c0_i32 = arith.constant 0 : i32
    %c0_i32_0 = arith.constant 0 : i32
    return %3, %arg0, %c0_i32 : i32, i32, i32
  }
  func.func @transform_3(%arg0: i32, %arg1: i32, %arg2: memref<16xi32, #tpu.memory_space<smem>>) -> (i32, i32, i32) {
    %c8_i32 = arith.constant 8 : i32
    %0 = arith.muli %arg1, %c8_i32 : i32
    %c3_i32 = arith.constant 3 : i32
    %1 = arith.addi %0, %c3_i32 : i32
    %2 = arith.index_cast %1 : i32 to index
    %3 = memref.load %arg2[%2] : memref<16xi32, #tpu.memory_space<smem>>
    %c0_i32 = arith.constant 0 : i32
    %c0_i32_0 = arith.constant 0 : i32
    return %3, %arg0, %c0_i32 : i32, i32, i32
  }
  func.func @transform_4(%arg0: i32, %arg1: i32, %arg2: memref<16xi32, #tpu.memory_space<smem>>) -> (i32, i32, i32) {
    %c8_i32 = arith.constant 8 : i32
    %0 = arith.muli %arg1, %c8_i32 : i32
    %c4_i32 = arith.constant 4 : i32
    %1 = arith.addi %0, %c4_i32 : i32
    %2 = arith.index_cast %1 : i32 to index
    %3 = memref.load %arg2[%2] : memref<16xi32, #tpu.memory_space<smem>>
    %c0_i32 = arith.constant 0 : i32
    %c0_i32_0 = arith.constant 0 : i32
    return %3, %arg0, %c0_i32 : i32, i32, i32
  }
  func.func @transform_5(%arg0: i32, %arg1: i32, %arg2: memref<16xi32, #tpu.memory_space<smem>>) -> (i32, i32, i32) {
    %c8_i32 = arith.constant 8 : i32
    %0 = arith.muli %arg1, %c8_i32 : i32
    %c5_i32 = arith.constant 5 : i32
    %1 = arith.addi %0, %c5_i32 : i32
    %2 = arith.index_cast %1 : i32 to index
    %3 = memref.load %arg2[%2] : memref<16xi32, #tpu.memory_space<smem>>
    %c0_i32 = arith.constant 0 : i32
    %c0_i32_0 = arith.constant 0 : i32
    return %3, %arg0, %c0_i32 : i32, i32, i32
  }
  func.func @transform_6(%arg0: i32, %arg1: i32, %arg2: memref<16xi32, #tpu.memory_space<smem>>) -> (i32, i32, i32) {
    %c8_i32 = arith.constant 8 : i32
    %0 = arith.muli %arg1, %c8_i32 : i32
    %c6_i32 = arith.constant 6 : i32
    %1 = arith.addi %0, %c6_i32 : i32
    %2 = arith.index_cast %1 : i32 to index
    %3 = memref.load %arg2[%2] : memref<16xi32, #tpu.memory_space<smem>>
    %c0_i32 = arith.constant 0 : i32
    %c0_i32_0 = arith.constant 0 : i32
    return %3, %arg0, %c0_i32 : i32, i32, i32
  }
  func.func @transform_7(%arg0: i32, %arg1: i32, %arg2: memref<16xi32, #tpu.memory_space<smem>>) -> (i32, i32, i32) {
    %c8_i32 = arith.constant 8 : i32
    %0 = arith.muli %arg1, %c8_i32 : i32
    %c7_i32 = arith.constant 7 : i32
    %1 = arith.addi %0, %c7_i32 : i32
    %2 = arith.index_cast %1 : i32 to index
    %3 = memref.load %arg2[%2] : memref<16xi32, #tpu.memory_space<smem>>
    %c0_i32 = arith.constant 0 : i32
    %c0_i32_0 = arith.constant 0 : i32
    return %3, %arg0, %c0_i32 : i32, i32, i32
  }
  func.func @transform_8(%arg0: i32, %arg1: i32, %arg2: memref<16xi32, #tpu.memory_space<smem>>) -> (i32, i32, i32) {
    %c0_i32 = arith.constant 0 : i32
    %c0_i32_0 = arith.constant 0 : i32
    %c0_i32_1 = arith.constant 0 : i32
    return %c0_i32, %arg0, %c0_i32_0 : i32, i32, i32
  }
}

</mosaic_0001>

<bundles_post_ra>
// kernel: tpu_custom_call.1
= control target key start
LH: loop header
LB: loop body
LE: loop exit
PB: predicated region body
PF: predicated region fallthrough
CT: control target
= control target key end

     0   :  { %s3169_s0 = inlined_call_operand.hbm [shape: s32[16], index: 0, kind: input, shape index: {}]   ;;  %s3170_s1 = inlined_call_operand.hbm [shape: f32[25,16,128], index: 1, kind: input, shape index: {}]   ;;  %s3171_s2 = inlined_call_operand.hbm [shape: f32[25,16,128], index: 2, kind: input, shape index: {}]   ;;  %s3172_s3 = inlined_call_operand.hbm [shape: f32[25,16,128], index: 3, kind: input, shape index: {}]   ;;  %s3173_s4 = inlined_call_operand.hbm [shape: f32[25,16,128], index: 4, kind: input, shape index: {}]   ;;  %s3174_s5 = inlined_call_operand.hbm [shape: f32[25,16,128], index: 5, kind: input, shape index: {}]   ;;  %s3175_s6 = inlined_call_operand.hbm [shape: f32[25,16,128], index: 6, kind: input, shape index: {}]   ;;  %s3176_s7 = inlined_call_operand.hbm [shape: f32[25,16,128], index: 7, kind: input, shape index: {}]   ;;  %s3177_s8 = inlined_call_operand.hbm [shape: f32[25,16,128], index: 8, kind: input, shape index: {}]   ;;  %s3178_s9 = inlined_call_operand.hbm [shape: f32[1,16,128], index: 9, kind: output, shape index: {}]  }
   0x1   :  { %3260 = sst [smem:[#allocation89_spill]] %s3170_s1  ;;  %s1411_s11 = scalar_lea.hbm %s3169_s0, 16 }
   0x2   :  { %3261 = sst [smem:[#allocation90_spill]] %s3171_s2  ;;  %p1412_p0 = scmp.ne.s32.totalorder %s3169_s0, %s1411_s11 }
   0x3   :  { %3262 = sst [smem:[#allocation91_spill]] %s3172_s3  ;;  %p1415_p1 = scmp.lt.u32.totalorder %s1411_s11, %s3169_s0 }
   0x4   :  { %3263 = sst [smem:[#allocation92_spill]] %s3173_s4 }
   0x5   :  { %3264 = sst [smem:[#allocation93_spill]] %s3174_s5  ;;  %p1417_p2 = pnand %p1415_p1, %p1412_p0 }
   0x6   :  { %3265 = sst [smem:[#allocation94_spill]] %s3175_s6 }
   0x7   :  { %3266 = sst [smem:[#allocation95_spill]] %s3176_s7 }
   0x8   :  { %3267 = sst [smem:[#allocation96_spill]] %s3177_s8 }
   0x9   :  { %3268 = sst [smem:[#allocation97_spill]] %s3178_s9 }
   0xa   :  { %1420 = shalt.err (!%p1417_p2)  }
   0xb   :  { %s1983_s16 = smov [#allocation4]  }
   0xc   :  { %15 = dma.hbm_to_smem %s3169_s0, 16, %s1983_s16, [#allocation3] }
   0xd   :  { %1817 = dma.done.wait [#allocation3], 16 }
   0xe   :  { %1818 = vsyncadd [#allocation3], 4294967280 }
   0xf   :  { %17 = sfence }
  0x10   :  { %18 = vsyncpa [#allocation6], 0 }
  0x11   :  { %20 = vsyncpa [#allocation6 + $0x1], 0 }
  0x12   :  { %21 = vsyncpa [#allocation9], 0 }
  0x13   :  { %23 = vsyncpa [#allocation9 + $0x1], 0 }
  0x14   :  { %24 = vsyncpa [#allocation12], 0 }
  0x15   :  { %26 = vsyncpa [#allocation12 + $0x1], 0 }
  0x16   :  { %27 = vsyncpa [#allocation15], 0 }
  0x17   :  { %29 = vsyncpa [#allocation15 + $0x1], 0 }
  0x18   :  { %30 = vsyncpa [#allocation18], 0 }
  0x19   :  { %32 = vsyncpa [#allocation18 + $0x1], 0 }
  0x1a   :  { %33 = vsyncpa [#allocation7], 0 }
  0x1b   :  { %35 = vsyncpa [#allocation7 + $0x1], 0  ;;  %s2056_s19 = smov 0   ;;  %s2058_s20 = smov 0  }
  0x1c   :  { %s2060_s0 = smov 0   ;;  %s2062_s21 = smov 0  }
  0x1d   :  { %s2064_s22 = smov 0   ;;  %s2066_s23 = smov 0  }
  0x1e   :  { %s2068_s24 = smov 0   ;;  %s2070_s25 = smov 0  }
  0x1f   :  { %3269 = sst [smem:[#allocation46_spill]] %s2068_s24  ;;  %s2072_s26 = smov 0  }
  0x20   :  { %3270 = sst [smem:[#allocation47_spill]] %s2070_s25  ;;  %s2074_s27 = smov 0  }
  0x21   :  { %3271 = sst [smem:[#allocation48_spill]] %s2074_s27  ;;  %s2076_s28 = smov 0  }
  0x22   :  { %s2078_s29 = smov 0   ;;  %s2080_s30 = smov 0  }
  0x23   :  { %s2082_s10 = smov 0   ;;  %s2084_s11 = smov 0  }
  0x24   :  { %s2086_s12 = smov 0   ;;  %s2088_s13 = smov 0  }
  0x25   :  { %3272 = sst [smem:[#allocation49_spill]] %s2086_s12  ;;  %s2090_s14 = smov 0  }
  0x26   :  { %s2092_s15 = smov 0   ;;  %s2094_s16 = smov 0  }
  0x27   :  { %3273 = sst [smem:[#allocation50_spill]] %s2092_s15  ;;  %s2096_s17 = smov 0  }
  0x28   :  { %3274 = sst [smem:[#allocation51_spill]] %s2096_s17  ;;  %s2098_s18 = smov 0  }
  0x29   :  { %3275 = sst [smem:[#allocation52_spill]] %s2098_s18  ;;  %s2100_s9 = smov 0  }
  0x2a   :  { %s2102_s8 = smov 0   ;;  %s2104_s7 = smov 0  }
  0x2b   :  { %3276 = sst [smem:[#allocation53_spill]] %s2102_s8  ;;  %s2106_s5 = smov 0  }
  0x2c   :  { %s2108_s3 = smov 0   ;;  %s2110_s1 = smov 0  }
  0x2d   :  { %3277 = sst [smem:[#allocation54_spill]] %s2108_s3  ;;  %s2112_s6 = smov 0  }
  0x2e   :  { %3278 = sst [smem:[#allocation55_spill]] %s2110_s1  ;;  %s2114_s4 = smov 0  }
  0x2f   :  { %3279 = sst [smem:[#allocation56_spill]] %s2114_s4  ;;  %s2116_s2 = smov 0  }
  0x30   :  { %s2118_s17 = smov 0  }
  0x31   :  { %3280 = sst [smem:[#allocation57_spill]] %s2118_s17 }
  0x32 LB: > { %s3293_s24 = sld [smem:[#allocation46_spill]]  ;;  %s3294_s25 = sld [smem:[#allocation47_spill]]  ;;  %s1977_s2 = sphi %s2116_s2, %s3548_s2   ;;  %s1969_s6 = sphi %s2112_s6, %s3546_s6   ;;  %s1957_s5 = sphi %s2106_s5, %s3543_s5   ;;  %s1953_s7 = sphi %s2104_s7, %s3542_s7   ;;  %s1945_s9 = sphi %s2100_s9, %s3540_s9   ;;  %s1933_s16 = sphi %s2094_s16, %s3515_s16   ;;  %s1925_s14 = sphi %s2090_s14, %s3511_s14   ;;  %s1921_s13 = sphi %s2088_s13, %s3535_s13   ;;  %s1913_s11 = sphi %s2084_s11, %s3531_s11   ;;  %s1909_s10 = sphi %s2082_s10, %s3529_s10   ;;  %s1905_s30 = sphi %s2080_s30, %s3504_s30   ;;  %s1901_s29 = sphi %s2078_s29, %s3503_s29   ;;  %s1897_s28 = sphi %s2076_s28, %s3502_s28   ;;  %s1889_s26 = sphi %s2072_s26, %s3523_s26   ;;  %s1877_s23 = sphi %s2066_s23, %s3517_s23   ;;  %s1873_s22 = sphi %s2064_s22, %s3497_s22   ;;  %s1869_s21 = sphi %s2062_s21, %s3514_s21   ;;  %s1865_s0 = sphi %s2060_s0, %s3512_s0   ;;  %s1861_s20 = sphi %s2058_s20, %s3494_s20   ;;  %s1857_s19 = sphi %s2056_s19, %s3493_s19  }
  0x33   : > { %s3295_s27 = sld [smem:[#allocation48_spill]]  ;;  %s3296_s12 = sld [smem:[#allocation49_spill]] }
  0x34   : > { %3297 = sst [smem:[#allocation46_spill]] %s1857_s19  ;;  %s3300_s15 = sld [smem:[#allocation50_spill]] }
  0x35   : > { %3298 = sst [smem:[#allocation47_spill]] %s1861_s20  ;;  %s3303_s17 = sld [smem:[#allocation51_spill]] }
  0x36   : > { %3299 = sst [smem:[#allocation48_spill]] %s1865_s0  ;;  %s3305_s18 = sld [smem:[#allocation52_spill]] }
  0x37   : > { %3301 = sst [smem:[#allocation50_spill]] %s1869_s21  ;;  %s3308_s8 = sld [smem:[#allocation53_spill]] }
  0x38   : > { %3302 = sst [smem:[#allocation49_spill]] %s1873_s22  ;;  %s3311_s3 = sld [smem:[#allocation54_spill]] }
  0x39   : > { %3304 = sst [smem:[#allocation51_spill]] %s1877_s23  ;;  %s3313_s1 = sld [smem:[#allocation55_spill]] }
  0x3a   : > { %3306 = sst [smem:[#allocation52_spill]] %s3293_s24  ;;  %s3316_s4 = sld [smem:[#allocation56_spill]] }
  0x3b   : > { %3307 = sst [smem:[#allocation58_spill]] %s3294_s25  ;;  %s3318_s21 = sld [smem:[#allocation57_spill]] }
  0x3c   : > { %3309 = sst [smem:[#allocation53_spill]] %s1889_s26  ;;  %p113_p8 = scmp.ne.s32.totalorder %s1945_s9, %s3305_s18 }
  0x3d   : > { %3310 = sst [smem:[#allocation59_spill]] %s1897_s28  ;;  %s100_s26 = sadd.s32 1, %s3308_s8 }
  0x3e   : > { %3312 = sst [smem:[#allocation54_spill]] %s1901_s29  ;;  %p107_p7 = scmp.ne.s32.totalorder %s3308_s8, %s1945_s9 }
  0x3f   : > { %3314 = sst [smem:[#allocation55_spill]] %s1905_s30  ;;  %s330_s30 = sadd.s32 1, %s1865_s0 }
  0x40   : > { %3315 = sst [smem:[#allocation60_spill]] %s1909_s10  ;;  %s50_s22 = sadd.s32 1, %s3316_s4 }
  0x41   : > { %3317 = sst [smem:[#allocation56_spill]] %s1913_s11  ;;  %p51_p3 = scmp.ge.s32.totalorder %s50_s22, 2 }
  0x42   : > { %3319 = sst [smem:[#allocation57_spill]] %s1925_s14  ;;  %s2223_s24 = sshll.u32 %s3316_s4, 3 }
  0x43   : > { %3320 = sst [smem:[#allocation61_spill]] %s3300_s15  ;;  %s3332_s15 = smov %s3318_s21 }
  0x44   : > { %3321 = sst [smem:[#allocation62_spill]] %s1933_s16  ;;  %s2217_s23 = sadd.s32 4294967295, %s3332_s15  }
  0x45   : > { %3322 = sst [smem:[#allocation63_spill]] %s3303_s17  ;;  %p3217_p4 = scmp.eq.s32.totalorder %s3332_s15, 0 }
  0x46   : > { %3323 = sst [smem:[#allocation64_spill]] %s1945_s9  ;;  %p3216_p5 = scmp.eq.s32.totalorder %s2217_s23, 0 }
  0x47   : > { %3324 = sst [smem:[#allocation65_spill]] %s3308_s8  ;;  %s3552_s22 = smov (%p51_p3, %s50_s22), 0 }
  0x48   : > { %3325 = sst [smem:[#allocation66_spill]] %s1953_s7  ;;  %s3334_s11 = smov %s3552_s22 }
  0x49   : > { %3326 = sst [smem:[#allocation67_spill]] %s3311_s3  ;;  %p2250_p9 = por %p107_p7, %p3217_p4 }
  0x4a   : > { %3327 = sst [smem:[#allocation68_spill]] %s3313_s1  ;;  %s3197_s1 = sadd.s32 1, %s2223_s24 }
  0x4b   : > { %3328 = sst [smem:[#allocation69_spill]] %s1969_s6  ;;  %s53_s6 = sadd.s32 1, %s1977_s2 }
  0x4c   : > { %3329 = sst [smem:[#allocation70_spill]] %s3316_s4  ;;  %s3554_s6 = smov (!%p51_p3, %s53_s6), %s1977_s2 }
  0x4d   : > { %3330 = sst [smem:[#allocation71_spill]] %s1977_s2  ;;  %p55_p6 = scmp.ge.s32.totalorder %s3554_s6, 2 }
  0x4e   : > { %3331 = sst [smem:[#allocation72_spill]] %s3318_s21  ;;  %s2231_s21 = sshll.u32 %s3334_s11, 3 }
  0x4f   : > { %3333 = sst [smem:[#allocation73_spill]] %s3552_s22  ;;  %s93_s25 = sadd.s32 1, %s2231_s21 }
  0x50   : > { %s91_s4 = sld [smem:[#allocation4 + %s3197_s1]]  ;;  %s3556_s6 = smov (%p55_p6, %s3554_s6), 0 }
  0x51   : > { %3335 = sst [smem:[#allocation74_spill]] %s3556_s6  ;;  %s2244_s11 = ssub.s32 %s1977_s2, %s3556_s6 }
  0x52   : > { %s94_s22 = sld [smem:[#allocation4 + %s93_s25]]  ;;  %p328_p10 = scmp.eq.s32.totalorder %s2244_s11, 0 }
  0x53   : > { %p2257_p11 = por %p113_p8, %p3216_p5  ;;  %p340_p12 = scmp.ne.s32.totalorder %s1865_s0, %s1861_s20 }
  0x54   : > { %s2263_s6 = scalar_select %p328_p10, %s1865_s0, %s330_s30  }
  0x55   : > { %s3337_s25 = scalar_select %p2257_p11, 1, 0 }
  0x56   : > { %3339 = sst [smem:[#allocation76_spill]] %s2263_s6  ;;  %p341_p13 = scmp.eq.s32.totalorder %s2217_s23, 3 }
  0x57   : > { %3338 = sst [smem:[#allocation75_spill]] %s3337_s25  ;;  %p346_p0 = scmp.ne.s32.totalorder %s1861_s20, %s1857_s19 }
  0x58   : > { %s95_s18 = ssub.s32 %s91_s4, %s94_s22  ;;  %p2271_p1 = por %p341_p13, %p340_p12 }
  0x59   : > { %s97_s9 = sor.u32 %s95_s18, %s2244_s11  ;;  %s3342_s25 = sadd.s32 4294967294, %s3332_s15  }
  0x5a   : > { %s3340_s10 = scalar_select %p2271_p1, 1, 0 }
  0x5b   : > { %p98_p2 = scmp.eq.s32.totalorder %s97_s9, 0  ;;  %p347_p3 = scmp.eq.s32.totalorder %s3342_s25, 3 }
  0x5c   : > { %3341 = sst [smem:[#allocation77_spill]] %s3340_s10  ;;  %p3215_p6 = scmp.lt.s32.totalorder %s3332_s15, 4 }
  0x5d   : > { %s2279_s30 = scalar_select %p98_p2, %s3308_s8, %s100_s26  }
  0x5e   : > { %p2281_p7 = por %p347_p3, %p346_p0  ;;  %s2286_s4 = sand.u32 1, %s3332_s15  }
  0x5f   : > { %3343 = sst [smem:[#allocation78_spill]] %s2279_s30  ;;  %s391_s22 = sand.u32 1, %s3308_s8  }
  0x60   : > { %s3344_s6 = scalar_select %p2281_p7, 1, 0 }
  0x61   : > { %3346 = sst [smem:[#allocation80_spill]] %s2286_s4  ;;  %s1028_s18 = sshll.u32 %s391_s22, 3 }
  0x62   : > { %3345 = sst [smem:[#allocation79_spill]] %s3344_s6  ;;  %p2293_p8 = pnand %p3215_p6, %p2250_p9 }
  0x63   : > { %p1056_p10 = scmp.ge.s32.totalorder %s3332_s15, 1  ;;  %s3348_s25 = sadd.s32 1, %s2223_s24 }
  0x64   : > { %s1075_s26 = scalar_select %p2250_p9, [#allocation4], [#allocation21] }
  0x65   : > { %s3558_s25 = smov (!%p2250_p9, %s3348_s25), 0  ;;  %s393_s22 = scalar_lea.vmem [#allocation8], %s1028_s18 }
  0x66   : > { %s3560_s26 = smov (!%p3215_p6, %s1075_s26), [#allocation29]  ;;  %s3562_s25 = smov (!%p3215_p6, %s3558_s25), 0 }
  0x67   : > { %s405_s30 = sshll.u32 %s393_s22, 4  ;;  %s396_s8 = sld [smem:[%s3560_s26 + %s3562_s25]]  ;;  %s2308_s30 = int_to_ptr.vmem [resolvable:$true] %s405_s30 }
  0x68   : > { %p548_p12 = scmp.lt.s32.totalorder %s3332_s15, 5  ;;  %s158_s1 = sadd.s32 3, %s2223_s24 }
  0x69   : > { %s161_s6 = sadd.s32 3, %s2231_s21  ;;  %s2319_s10 = sld [smem:[#allocation4 + %s158_s1]] }
  0x6a   : > { %p2311_p13 = pnand %p1056_p10, %p548_p12  ;;  %s2322_s18 = sld [smem:[#allocation4 + %s161_s6]] }
  0x6b   : > { %s168_s26 = sadd.s32 1, %s1925_s14  ;;  %s3351_s17 = sld [smem:[#allocation90_spill]] }
  0x6c   : > { %s3349_s0 = scalar_select %p2311_p13, 1, 0 }
  0x6d   : > { %s1030_s19 = sshll.u32 %s396_s8, 1  ;;  %p1423_p2 = pneg %p2293_p8 }
  0x6e   : > { %3350 = sst [smem:[#allocation81_spill]] %s3349_s0  ;;  %s401_s20 = sadd.s32 %s1977_s2, %s1030_s19 }
  0x6f   : > { %s1031_s22 = sshll.u32 %s401_s20, 7  ;;  %s3220_s0 = scalar_lea.sflag [#allocation9], %s2286_s4 }
  0x71   : > { %s2328_s7 = scalar_lea.hbm %s3351_s17, %s1031_s22  ;;  %s1426_s20 = scalar_lea.hbm %s3351_s17, 6400 }
  0x72   : > { %s1421_s8 = scalar_lea.hbm %s2328_s7, 128  ;;  %p1427_p12 = scmp.lt.u32.totalorder %s2328_s7, %s3351_s17 }
  0x73   : > { %p1422_p0 = scmp.ne.s32.totalorder %s2328_s7, %s1421_s8  ;;  %p1428_p6 = scmp.lt.u32.totalorder %s1426_s20, %s1421_s8 }
  0x74   : > { %p1430_p9 = scmp.lt.u32.totalorder %s1421_s8, %s2328_s7 }
  0x75   : > { %p1424_p3 = pnand %p1423_p2, %p1422_p0  ;;  %p1429_p5 = por %p1428_p6, %p1427_p12 }
  0x77   : > { %p1425_p10 = pneg %p1424_p3  ;;  %p1431_p4 = por %p1430_p9, %p1429_p5 }
  0x79   : > { %p1432_p7 = pnand %p1431_p4, %p1425_p10 }
  0x7b   : > { %1435 = shalt.err (!%p1432_p7)
}
  0x7c   : > { %s1436_s25 = scalar_lea.vmem %s2308_s30, 128  ;;  %s1984_s6 = smov [#allocation8]  }
  0x7d   : > { %p1437_p0 = scmp.ne.s32.totalorder %s2308_s30, %s1436_s25  ;;  %s1441_s19 = sshll.u32 %s1984_s6, 4  ;;  %s1442_s19 = int_to_ptr.vmem [resolvable:$false] %s1441_s19 }
  0x7e   : > { %s1443_s16 = scalar_lea.vmem %s1442_s19, 256  ;;  %p1444_p11 = scmp.lt.s32.totalorder %s2308_s30, %s1442_s19 }
  0x7f   : > { %p1439_p3 = pnand %p1437_p0, %p1423_p2  ;;  %p1445_p6 = scmp.lt.s32.totalorder %s1443_s16, %s1436_s25 }
  0x81   : > { %p1440_p1 = pneg %p1439_p3  ;;  %p1446_p12 = por %p1445_p6, %p1444_p11 }
  0x83   : > { %p1447_p5 = pnand %p1446_p12, %p1440_p1 }
  0x85   : > { %1450 = shalt.err (!%p1447_p5)
}
  0x86   : > { %1116 = dma.hbm_to_vmem [thread:$0]  (!%p2293_p8), %s2328_s7, 128, %s2308_s30, %s3220_s0  }
  0x87   : > { %p3352_p4 = scmp.eq.s32.totalorder %s3332_s15, 0  ;;  %p3353_p11 = scmp.ne.s32.totalorder %s1925_s14, %s1921_s13 }
  0x88   : > { %p181_p7 = scmp.ne.s32.totalorder %s1921_s13, %s3296_s12  ;;  %s437_s8 = sand.u32 1, %s1925_s14  }
  0x89   : > { %p2365_p1 = por %p3353_p11, %p3352_p4  ;;  %s163_s20 = ssub.s32 %s2319_s10, %s2322_s18 }
  0x8a   : > { %p3355_p9 = scmp.eq.s32.totalorder %s2217_s23, 0  ;;  %s165_s7 = sor.u32 %s163_s20, %s2244_s11 }
  0x8b   : > { %s1036_s30 = sshll.u32 %s437_s8, 3  ;;  %p166_p8 = scmp.eq.s32.totalorder %s165_s7, 0 }
  0x8c   : > { %p2376_p2 = por %p181_p7, %p3355_p9  ;;  %s3564_s1 = smov (!%p2365_p1, %s158_s1), 0 }
  0x8d   : > { %s1081_s25 = scalar_select %p2365_p1, [#allocation4], [#allocation23] }
  0x8e   : > { %s3356_s22 = scalar_select %p2376_p2, 1, 0 }
  0x8f   : > { %s2386_s6 = scalar_select %p166_p8, %s1925_s14, %s168_s26  }
  0x90   : > { %3357 = sst [smem:[#allocation82_spill]] %s3356_s22  ;;  %p3359_p10 = scmp.lt.s32.totalorder %s3332_s15, 4 }
  0x91   : > { %3358 = sst [smem:[#allocation83_spill]] %s2386_s6  ;;  %s439_s10 = scalar_lea.vmem [#allocation11], %s1036_s30 }
  0x92   : > { %s3566_s25 = smov (!%p3359_p10, %s1081_s25), [#allocation31]  ;;  %p3360_p0 = pmov %p3359_p10 }
  0x93   : > { %s451_s12 = sshll.u32 %s439_s10, 4  ;;  %s3223_s19 = sadd.s32 5, %s2223_s24  ;;  %s2404_s12 = int_to_ptr.vmem [resolvable:$true] %s451_s12 }
  0x94   : > { %s3568_s1 = smov (!%p3360_p0, %s3564_s1), 0  ;;  %p3361_p3 = pmov %p3360_p0 }
  0x95   : > { %s442_s26 = sld [smem:[%s3566_s25 + %s3568_s1]]  ;;  %s229_s8 = sadd.s32 5, %s2231_s21 }
  0x96   : > { %p2400_p6 = pnand %p3361_p3, %p2365_p1  ;;  %s2409_s16 = sld [smem:[#allocation4 + %s3223_s19]] }
  0x97   : > { %s2412_s7 = sld [smem:[#allocation4 + %s229_s8]]  ;;  %s236_s9 = sadd.s32 1, %s1901_s29 }
  0x98   : > { %s3363_s6 = sld [smem:[#allocation92_spill]]  ;;  %s3225_s25 = scalar_lea.sflag [#allocation12], %s2286_s4 }
  0x99   : > { %p1453_p11 = pneg %p2400_p6 }
  0x9b   : > { %s1038_s20 = sshll.u32 %s442_s26, 1 }
  0x9c   : > { %s447_s30 = sadd.s32 %s1977_s2, %s1038_s20 }
  0x9d   : > { %s1039_s10 = sshll.u32 %s447_s30, 7 }
  0x9e   : > { %s3364_s3 = smov %s3363_s6  ;;  %s2421_s1 = scalar_lea.hbm %s3363_s6, %s1039_s10 }
  0x9f   : > { %s1451_s19 = scalar_lea.hbm %s2421_s1, 128  ;;  %s1456_s0 = scalar_lea.hbm %s3364_s3, 6400 }
  0xa0   : > { %p1452_p4 = scmp.ne.s32.totalorder %s2421_s1, %s1451_s19  ;;  %p1457_p9 = scmp.lt.u32.totalorder %s2421_s1, %s3364_s3 }
  0xa1   : > { %p1458_p8 = scmp.lt.u32.totalorder %s1456_s0, %s1451_s19  ;;  %p1460_p0 = scmp.lt.u32.totalorder %s1451_s19, %s2421_s1 }
  0xa2   : > { %p1454_p1 = pnand %p1453_p11, %p1452_p4 }
  0xa3   : > { %p1459_p10 = por %p1458_p8, %p1457_p9 }
  0xa4   : > { %p1455_p7 = pneg %p1454_p1 }
  0xa5   : > { %p1461_p3 = por %p1460_p0, %p1459_p10 }
  0xa7   : > { %p1462_p5 = pnand %p1461_p3, %p1455_p7 }
  0xa9   : > { %1465 = shalt.err (!%p1462_p5)
}
  0xaa   : > { %s1466_s20 = scalar_lea.vmem %s2404_s12, 128  ;;  %s1985_s30 = smov [#allocation11]  }
  0xab   : > { %p1467_p4 = scmp.ne.s32.totalorder %s2404_s12, %s1466_s20  ;;  %s1471_s10 = sshll.u32 %s1985_s30, 4  ;;  %s1472_s10 = int_to_ptr.vmem [resolvable:$false] %s1471_s10 }
  0xac   : > { %s1473_s26 = scalar_lea.vmem %s1472_s10, 256  ;;  %p1474_p2 = scmp.lt.s32.totalorder %s2404_s12, %s1472_s10 }
  0xad   : > { %p1469_p1 = pnand %p1467_p4, %p1453_p11  ;;  %p1475_p9 = scmp.lt.s32.totalorder %s1473_s26, %s1466_s20 }
  0xaf   : > { %p1470_p12 = pneg %p1469_p1  ;;  %p1476_p8 = por %p1475_p9, %p1474_p2 }
  0xb1   : > { %p1477_p10 = pnand %p1476_p8, %p1470_p12 }
  0xb3   : > { %1480 = shalt.err (!%p1477_p10)
}
  0xb4   : > { %1126 = dma.hbm_to_vmem [thread:$0]  (!%p2400_p6), %s2421_s1, 128, %s2404_s12, %s3225_s25  }
  0xb5   : > { %p3365_p2 = scmp.eq.s32.totalorder %s3332_s15, 0  ;;  %p3366_p12 = scmp.ne.s32.totalorder %s1901_s29, %s1897_s28 }
  0xb6   : > { %p3367_p11 = scmp.eq.s32.totalorder %s2217_s23, 0  ;;  %p3368_p7 = scmp.ne.s32.totalorder %s1897_s28, %s3295_s27 }
  0xb7   : > { %p245_p5 = por %p3366_p12, %p3365_p2  ;;  %s231_s19 = ssub.s32 %s2409_s16, %s2412_s7 }
  0xb8   : > { %p2463_p0 = por %p3368_p7, %p3367_p11  ;;  %s233_s8 = sor.u32 %s231_s19, %s2244_s11 }
  0xb9   : > { %s483_s0 = sand.u32 1, %s1901_s29   ;;  %p234_p3 = scmp.eq.s32.totalorder %s233_s8, 0 }
  0xba   : > { %s3369_s18 = scalar_select %p2463_p0, 1, 0 }
  0xbb   : > { %s1044_s17 = sshll.u32 %s483_s0, 3  ;;  %p3371_p4 = scmp.lt.s32.totalorder %s3332_s15, 4 }
  0xbc   : > { %3370 = sst [smem:[#allocation84_spill]] %s3369_s18  ;;  %s3372_s6 = sld [smem:[#allocation67_spill]] }
  0xbd   : > { %p2473_p6 = pnand %p3371_p4, %p245_p5  ;;  %s3375_s16 = sadd.s32 5, %s2223_s24 }
  0xbe   : > { %s2480_s27 = scalar_select %p234_p3, %s1901_s29, %s236_s9  }
  0xbf   : > { %s1087_s1 = scalar_select %p245_p5, [#allocation4], [#allocation25] }
  0xc0   : > { %3374 = sst [smem:[#allocation85_spill]] %s2480_s27  ;;  %s3570_s16 = smov (!%p245_p5, %s3375_s16), 0 }
  0xc1   : > { %p3376_p1 = pmov %p3371_p4  ;;  %s485_s7 = scalar_lea.vmem [#allocation14], %s1044_s17 }
  0xc2   : > { %s497_s20 = sshll.u32 %s485_s7, 4  ;;  %s2491_s9 = sld [smem:[#allocation4 + %s2223_s24]]  ;;  %s2488_s20 = int_to_ptr.vmem [resolvable:$true] %s497_s20 }
  0xc3   : > { %s3572_s1 = smov (!%p3376_p1, %s1087_s1), [#allocation33]  ;;  %p3377_p9 = pmov %p3376_p1 }
  0xc4   : > { %s2495_s19 = sld [smem:[#allocation4 + %s2231_s21]]  ;;  %s66_s0 = sadd.s32 1, %s3372_s6 }
  0xc5   : > { %s3574_s16 = smov (!%p3377_p9, %s3570_s16), 0  ;;  %s3378_s14 = sld [smem:[#allocation94_spill]] }
  0xc6   : > { %s488_s30 = sld [smem:[%s3572_s1 + %s3574_s16]]  ;;  %s3231_s17 = scalar_lea.sflag [#allocation15], %s2286_s4 }
  0xc7   : > { %p1483_p2 = pneg %p2473_p6 }
  0xcb   : > { %s3379_s18 = smov %s3378_s14 }
  0xcc   : > { %s1046_s10 = sshll.u32 %s488_s30, 1  ;;  %s1486_s3 = scalar_lea.hbm %s3379_s18, 6400 }
  0xcd   : > { %s493_s26 = sadd.s32 %s1977_s2, %s1046_s10 }
  0xce   : > { %s1047_s8 = sshll.u32 %s493_s26, 7 }
  0xcf   : > { %s2501_s27 = scalar_lea.hbm %s3378_s14, %s1047_s8 }
  0xd0   : > { %s1481_s1 = scalar_lea.hbm %s2501_s27, 128  ;;  %p1487_p11 = scmp.lt.u32.totalorder %s2501_s27, %s3379_s18 }
  0xd1   : > { %p1482_p10 = scmp.ne.s32.totalorder %s2501_s27, %s1481_s1  ;;  %p1488_p7 = scmp.lt.u32.totalorder %s1486_s3, %s1481_s1 }
  0xd2   : > { %p1490_p4 = scmp.lt.u32.totalorder %s1481_s1, %s2501_s27 }
  0xd3   : > { %p1484_p12 = pnand %p1483_p2, %p1482_p10  ;;  %p1489_p3 = por %p1488_p7, %p1487_p11 }
  0xd5   : > { %p1485_p5 = pneg %p1484_p12  ;;  %p1491_p1 = por %p1490_p4, %p1489_p3 }
  0xd7   : > { %p1492_p9 = pnand %p1491_p1, %p1485_p5 }
  0xd9   : > { %1495 = shalt.err (!%p1492_p9)
}
  0xda   : > { %s1496_s30 = scalar_lea.vmem %s2488_s20, 128  ;;  %s1986_s10 = smov [#allocation14]  }
  0xdb   : > { %p1497_p10 = scmp.ne.s32.totalorder %s2488_s20, %s1496_s30  ;;  %s1501_s26 = sshll.u32 %s1986_s10, 4  ;;  %s1502_s26 = int_to_ptr.vmem [resolvable:$false] %s1501_s26 }
  0xdc   : > { %s1503_s8 = scalar_lea.vmem %s1502_s26, 256  ;;  %p1504_p0 = scmp.lt.s32.totalorder %s2488_s20, %s1502_s26 }
  0xdd   : > { %p1499_p12 = pnand %p1497_p10, %p1483_p2  ;;  %p1505_p11 = scmp.lt.s32.totalorder %s1503_s8, %s1496_s30 }
  0xdf   : > { %p1500_p8 = pneg %p1499_p12  ;;  %p1506_p7 = por %p1505_p11, %p1504_p0 }
  0xe1   : > { %p1507_p3 = pnand %p1506_p7, %p1500_p8 }
  0xe3   : > { %1510 = shalt.err (!%p1507_p3)
}
  0xe4   : > { %s3380_s1 = sld [smem:[#allocation66_spill]]  ;;  %p3381_p0 = scmp.ne.s32.totalorder %s3372_s6, %s1957_s5 }
  0xe5   : > { %1136 = dma.hbm_to_vmem [thread:$0]  (!%p2473_p6), %s2501_s27, 128, %s2488_s20, %s3231_s17  }
  0xe6   : > { %p3382_p8 = scmp.eq.s32.totalorder %s3332_s15, 0  ;;  %s367_s16 = sand.u32 1, %s3372_s6  }
  0xe7   : > { %s61_s7 = ssub.s32 %s2491_s9, %s2495_s19  ;;  %p3384_p4 = scmp.eq.s32.totalorder %s2217_s23, 0 }
  0xe8   : > { %p2538_p2 = por %p3382_p8, %p3381_p0  ;;  %s63_s27 = sor.u32 %s2244_s11, %s61_s7 }
  0xe9   : > { %p64_p6 = scmp.eq.s32.totalorder %s63_s27, 0  ;;  %s3387_s20 = sld [smem:[#allocation63_spill]] }
  0xea   : > { %p79_p5 = scmp.ne.s32.totalorder %s1957_s5, %s3380_s1  ;;  %s1024_s14 = sshll.u32 %s367_s16, 3 }
  0xeb   : > { %p3388_p9 = scmp.lt.s32.totalorder %s3332_s15, 4  ;;  %s3390_s30 = sld [smem:[#allocation62_spill]] }
  0xec   : > { %p2549_p1 = por %p3384_p4, %p79_p5  ;;  %s3576_s6 = smov (!%p64_p6, %s3372_s6), %s66_s0 }
  0xed   : > { %p2558_p10 = pnand %p3388_p9, %p2538_p2  ;;  %3391 = sst [smem:[#allocation86_spill]] %s3576_s6 }
  0xee   : > { %s3385_s3 = scalar_select %p2549_p1, 1, 0 }
  0xef   : > { %s1072_s9 = scalar_select %p2538_p2, [#allocation4], [#allocation20] }
  0xf0   : > { %3386 = sst [smem:[#allocation66_spill]] %s3385_s3  ;;  %s3392_s19 = sld [smem:[#allocation61_spill]] }
  0xf1   : > { %s1073_s10 = scalar_select %p2538_p2, %s2223_s24, 0 }
  0xf2   : > { %p3393_p12 = pmov %p3388_p9  ;;  %p3394_p11 = pmov %p3388_p9 }
  0xf3   : > { %s371_s26 = scalar_lea.vmem [#allocation5], %s1024_s14  ;;  %s3236_s0 = sadd.s32 2, %s2223_s24 }
  0xf4   : > { %s3578_s9 = smov (!%p3393_p12, %s1072_s9), [#allocation28]  ;;  %s3580_s10 = smov (!%p3394_p11, %s1073_s10), 0 }
  0xf5   : > { %s382_s8 = sshll.u32 %s371_s26, 4  ;;  %s373_s1 = sld [smem:[%s3578_s9 + %s3580_s10]]  ;;  %s2576_s8 = int_to_ptr.vmem [resolvable:$true] %s382_s8 }
  0xf6   : > { %s2581_s7 = sld [smem:[#allocation4 + %s3236_s0]]  ;;  %s127_s12 = sadd.s32 2, %s2231_s21 }
  0xf7   : > { %s2584_s27 = sld [smem:[#allocation4 + %s127_s12]]  ;;  %s134_s17 = sadd.s32 1, %s3387_s20 }
  0xf8   : > { %p141_p7 = scmp.ne.s32.totalorder %s3387_s20, %s3390_s30  ;;  %p147_p3 = scmp.ne.s32.totalorder %s3390_s30, %s3392_s19 }
  0xf9   : > { %p3395_p0 = pmov %p3382_p8  ;;  %s3397_s29 = sld [smem:[#allocation89_spill]] }
  0xfa   : > { %p3399_p2 = pmov %p3384_p4  ;;  %p1513_p6 = pneg %p2558_p10 }
  0xfb   : > { %s1026_s18 = sshll.u32 %s373_s1, 1  ;;  %p2594_p8 = por %p141_p7, %p3395_p0 }
  0xfc   : > { %s378_s6 = sadd.s32 %s1977_s2, %s1026_s18  ;;  %p2605_p5 = por %p147_p3, %p3399_p2 }
  0xfd   : > { %s1027_s14 = sshll.u32 %s378_s6, 7  ;;  %s368_s18 = scalar_lea.sflag [#allocation6], %s367_s16 }
  0xfe   : > { %s3400_s1 = scalar_select %p2605_p5, 1, 0 }
  0xff   : > { %s3398_s3 = smov %s3397_s29  ;;  %s2601_s0 = scalar_lea.hbm %s3397_s29, %s1027_s14 }
 0x100   : > { %3401 = sst [smem:[#allocation61_spill]] %s3400_s1  ;;  %s1511_s6 = scalar_lea.hbm %s2601_s0, 128 }
 0x101   : > { %p1512_p4 = scmp.ne.s32.totalorder %s2601_s0, %s1511_s6  ;;  %s1516_s19 = scalar_lea.hbm %s3398_s3, 6400 }
 0x102   : > { %p1517_p11 = scmp.lt.u32.totalorder %s2601_s0, %s3398_s3  ;;  %p1518_p7 = scmp.lt.u32.totalorder %s1516_s19, %s1511_s6 }
 0x103   : > { %p1514_p9 = pnand %p1513_p6, %p1512_p4  ;;  %p1520_p0 = scmp.lt.u32.totalorder %s1511_s6, %s2601_s0 }
 0x104   : > { %p1519_p3 = por %p1518_p7, %p1517_p11 }
 0x105   : > { %p1515_p12 = pneg %p1514_p9 }
 0x106   : > { %p1521_p2 = por %p1520_p0, %p1519_p3 }
 0x108   : > { %p1522_p5 = pnand %p1521_p2, %p1515_p12 }
 0x10a   : > { %1525 = shalt.err (!%p1522_p5)
}
 0x10b   : > { %s1526_s16 = scalar_lea.vmem %s2576_s8, 128  ;;  %s1987_s10 = smov [#allocation5]  }
 0x10c   : > { %p1527_p4 = scmp.ne.s32.totalorder %s2576_s8, %s1526_s16  ;;  %s1531_s26 = sshll.u32 %s1987_s10, 4  ;;  %s1532_s26 = int_to_ptr.vmem [resolvable:$false] %s1531_s26 }
 0x10d   : > { %s1533_s29 = scalar_lea.vmem %s1532_s26, 256  ;;  %p1534_p13 = scmp.lt.s32.totalorder %s2576_s8, %s1532_s26 }
 0x10e   : > { %p1529_p9 = pnand %p1527_p4, %p1513_p6  ;;  %p1535_p11 = scmp.lt.s32.totalorder %s1533_s29, %s1526_s16 }
 0x110   : > { %p1530_p1 = pneg %p1529_p9  ;;  %p1536_p7 = por %p1535_p11, %p1534_p13 }
 0x112   : > { %p1537_p3 = pnand %p1536_p7, %p1530_p1 }
 0x114   : > { %1540 = shalt.err (!%p1537_p3)
}
 0x115   : > { %1111 = dma.hbm_to_vmem [thread:$0]  (!%p2558_p10), %s2601_s0, 128, %s2576_s8, %s368_s18  }
 0x116   : > { %s129_s6 = ssub.s32 %s2581_s7, %s2584_s27  ;;  %s414_s25 = sand.u32 1, %s3387_s20  }
 0x117   : > { %s131_s30 = sor.u32 %s129_s6, %s2244_s11  ;;  %s1032_s19 = sshll.u32 %s414_s25, 3 }
 0x118   : > { %p132_p13 = scmp.eq.s32.totalorder %s131_s30, 0  ;;  %s3402_s14 = sld [smem:[#allocation56_spill]] }
 0x119   : > { %s1078_s12 = scalar_select %p2594_p8, [#allocation4], [#allocation22] }
 0x11a   : > { %s3582_s20 = smov (!%p132_p13, %s3387_s20), %s134_s17  ;;  %s3404_s10 = sadd.s32 2, %s2223_s24 }
 0x11b   : > { %3403 = sst [smem:[#allocation87_spill]] %s3582_s20  ;;  %s3584_s10 = smov (!%p2594_p8, %s3404_s10), 0 }
 0x11c   : > { %p3405_p1 = scmp.lt.s32.totalorder %s3332_s15, 4  ;;  %s3406_s8 = sld [smem:[#allocation60_spill]] }
 0x11d   : > { %s3408_s0 = sld [smem:[#allocation55_spill]]  ;;  %s416_s7 = scalar_lea.vmem [#allocation10], %s1032_s19 }
 0x11e   : > { %s3586_s12 = smov (!%p3405_p1, %s1078_s12), [#allocation30]  ;;  %p3407_p10 = pmov %p3405_p1 }
 0x11f   : > { %s428_s27 = sshll.u32 %s416_s7, 4  ;;  %p3409_p5 = pmov %p3405_p1  ;;  %s2661_s27 = int_to_ptr.vmem [resolvable:$true] %s428_s27 }
 0x120   : > { %s3588_s10 = smov (!%p3407_p10, %s3584_s10), 0  ;;  %s192_s20 = sadd.s32 4, %s2223_s24 }
 0x121   : > { %p2657_p6 = pnand %p3409_p5, %p2594_p8  ;;  %s419_s17 = sld [smem:[%s3586_s12 + %s3588_s10]] }
 0x122   : > { %s2666_s26 = sld [smem:[#allocation4 + %s192_s20]]  ;;  %s195_s29 = sadd.s32 4, %s2231_s21 }
 0x123   : > { %s2669_s25 = sld [smem:[#allocation4 + %s195_s29]]  ;;  %s202_s9 = sadd.s32 1, %s3402_s14 }
 0x124   : > { %p209_p8 = scmp.ne.s32.totalorder %s3402_s14, %s3406_s8  ;;  %s3411_s16 = sld [smem:[#allocation91_spill]] }
 0x125   : > { %p1543_p2 = pneg %p2657_p6 }
 0x127   : > { %s1034_s6 = sshll.u32 %s419_s17, 1 }
 0x128   : > { %s424_s30 = sadd.s32 %s1977_s2, %s1034_s6 }
 0x129   : > { %s1035_s19 = sshll.u32 %s424_s30, 7 }
 0x12a   : > { %s3412_s4 = smov %s3411_s16  ;;  %s2678_s28 = scalar_lea.hbm %s3411_s16, %s1035_s19 }
 0x12b   : > { %s1541_s12 = scalar_lea.hbm %s2678_s28, 128  ;;  %s1546_s29 = scalar_lea.hbm %s3412_s4, 6400 }
 0x12c   : > { %p1542_p0 = scmp.ne.s32.totalorder %s2678_s28, %s1541_s12  ;;  %p1547_p11 = scmp.lt.u32.totalorder %s2678_s28, %s3412_s4 }
 0x12d   : > { %p1548_p7 = scmp.lt.u32.totalorder %s1546_s29, %s1541_s12  ;;  %p1550_p13 = scmp.lt.u32.totalorder %s1541_s12, %s2678_s28 }
 0x12e   : > { %p1544_p4 = pnand %p1543_p2, %p1542_p0 }
 0x12f   : > { %p1549_p3 = por %p1548_p7, %p1547_p11 }
 0x130   : > { %p1545_p9 = pneg %p1544_p4 }
 0x131   : > { %p1551_p1 = por %p1550_p13, %p1549_p3 }
 0x133   : > { %p1552_p10 = pnand %p1551_p1, %p1545_p9 }
 0x135   : > { %1555 = shalt.err (!%p1552_p10)
}
 0x136   : > { %s1556_s6 = scalar_lea.vmem %s2661_s27, 128  ;;  %s1988_s30 = smov [#allocation10]  }
 0x137   : > { %p1557_p5 = scmp.ne.s32.totalorder %s2661_s27, %s1556_s6  ;;  %s1561_s19 = sshll.u32 %s1988_s30, 4  ;;  %s1562_s19 = int_to_ptr.vmem [resolvable:$false] %s1561_s19 }
 0x138   : > { %s1563_s7 = scalar_lea.vmem %s1562_s19, 256  ;;  %p1564_p12 = scmp.lt.s32.totalorder %s2661_s27, %s1562_s19 }
 0x139   : > { %p1559_p0 = pnand %p1557_p5, %p1543_p2  ;;  %p1565_p11 = scmp.lt.s32.totalorder %s1563_s7, %s1556_s6 }
 0x13b   : > { %p1560_p4 = pneg %p1559_p0  ;;  %p1566_p7 = por %p1565_p11, %p1564_p12 }
 0x13d   : > { %p1567_p3 = pnand %p1566_p7, %p1560_p4 }
 0x13f   : > { %1570 = shalt.err (!%p1567_p3)
}
 0x140   : > { %s3413_s12 = sld [smem:[#allocation80_spill]]  ;;  %p3415_p12 = scmp.eq.s32.totalorder %s3332_s15, 0 }
 0x141   : > { %p3417_p9 = scmp.eq.s32.totalorder %s2217_s23, 0  ;;  %p3418_p13 = scmp.ne.s32.totalorder %s3406_s8, %s3408_s0 }
 0x142   : > { %p2714_p2 = por %p209_p8, %p3415_p12  ;;  %s197_s29 = ssub.s32 %s2666_s26, %s2669_s25 }
 0x143   : > { %p2723_p1 = por %p3418_p13, %p3417_p9  ;;  %s460_s3 = sand.u32 1, %s3402_s14  }
 0x144   : > { %s1084_s16 = scalar_select %p2714_p2, [#allocation4], [#allocation24] }
 0x145   : > { %s3419_s17 = scalar_select %p2723_p1, 1, 0 }
 0x146   : > { %s3414_s10 = scalar_lea.sflag [#allocation9], %s3413_s12  ;;  %s3421_s8 = sld [smem:[#allocation53_spill]] }
 0x147   : > { %1121 = dma.hbm_to_vmem [thread:$0]  (!%p2657_p6), %s2678_s28, 128, %s2661_s27, %s3414_s10  }
 0x148   : > { %3420 = sst [smem:[#allocation55_spill]] %s3419_s17  ;;  %s199_s28 = sor.u32 %s197_s29, %s2244_s11 }
 0x149   : > { %s1040_s27 = sshll.u32 %s460_s3, 3  ;;  %p200_p6 = scmp.eq.s32.totalorder %s199_s28, 0 }
 0x14a   : > { %s3592_s20 = smov (!%p2714_p2, %s192_s20), 0  ;;  %p3423_p8 = scmp.lt.s32.totalorder %s3332_s15, 4 }
 0x14b   : > { %s3590_s14 = smov (!%p200_p6, %s3402_s14), %s202_s9  ;;  %s3424_s0 = sld [smem:[#allocation58_spill]] }
 0x14c   : > { %3422 = sst [smem:[#allocation88_spill]] %s3590_s14  ;;  %s3594_s16 = smov (!%p3423_p8, %s1084_s16), [#allocation32] }
 0x14d   : > { %p3425_p10 = pmov %p3423_p8  ;;  %s3426_s26 = sld [smem:[#allocation52_spill]] }
 0x14e   : > { %s462_s25 = scalar_lea.vmem [#allocation13], %s1040_s27  ;;  %p3427_p5 = pmov %p3423_p8 }
 0x14f   : > { %s3596_s20 = smov (!%p3425_p10, %s3592_s20), 0  ;;  %s474_s6 = sshll.u32 %s462_s25, 4  ;;  %s2754_s6 = int_to_ptr.vmem [resolvable:$true] %s474_s6 }
 0x150   : > { %p2750_p0 = pnand %p3427_p5, %p2714_p2  ;;  %s465_s9 = sld [smem:[%s3594_s16 + %s3596_s20]] }
 0x151   : > { %s260_s19 = sadd.s32 6, %s2223_s24  ;;  %s263_s10 = sadd.s32 6, %s2231_s21 }
 0x152   : > { %s2759_s7 = sld [smem:[#allocation4 + %s260_s19]]  ;;  %s270_s18 = sadd.s32 1, %s3421_s8 }
 0x153   : > { %s2762_s3 = sld [smem:[#allocation4 + %s263_s10]]  ;;  %p1573_p3 = pneg %p2750_p0 }
 0x154   : > { %s3429_s14 = sld [smem:[#allocation93_spill]] }
 0x156   : > { %s1042_s29 = sshll.u32 %s465_s9, 1 }
 0x157   : > { %s470_s28 = sadd.s32 %s1977_s2, %s1042_s29 }
 0x158   : > { %s1043_s27 = sshll.u32 %s470_s28, 7 }
 0x15a   : > { %s3430_s17 = smov %s3429_s14  ;;  %s2771_s22 = scalar_lea.hbm %s3429_s14, %s1043_s27 }
 0x15b   : > { %s1571_s20 = scalar_lea.hbm %s2771_s22, 128  ;;  %s1576_s10 = scalar_lea.hbm %s3430_s17, 6400 }
 0x15c   : > { %p1572_p7 = scmp.ne.s32.totalorder %s2771_s22, %s1571_s20  ;;  %p1577_p9 = scmp.lt.u32.totalorder %s2771_s22, %s3430_s17 }
 0x15d   : > { %p1578_p13 = scmp.lt.u32.totalorder %s1576_s10, %s1571_s20  ;;  %p1580_p8 = scmp.lt.u32.totalorder %s1571_s20, %s2771_s22 }
 0x15e   : > { %p1574_p12 = pnand %p1573_p3, %p1572_p7 }
 0x15f   : > { %p1579_p6 = por %p1578_p13, %p1577_p9 }
 0x160   : > { %p1575_p2 = pneg %p1574_p12 }
 0x161   : > { %p1581_p10 = por %p1580_p8, %p1579_p6 }
 0x163   : > { %p1582_p5 = pnand %p1581_p10, %p1575_p2 }
 0x165   : > { %1585 = shalt.err (!%p1582_p5)
}
 0x166   : > { %s1586_s29 = scalar_lea.vmem %s2754_s6, 128  ;;  %s1989_s28 = smov [#allocation13]  }
 0x167   : > { %p1587_p7 = scmp.ne.s32.totalorder %s2754_s6, %s1586_s29  ;;  %s1591_s27 = sshll.u32 %s1989_s28, 4  ;;  %s1592_s27 = int_to_ptr.vmem [resolvable:$false] %s1591_s27 }
 0x168   : > { %s1593_s25 = scalar_lea.vmem %s1592_s27, 256  ;;  %p1594_p4 = scmp.lt.s32.totalorder %s2754_s6, %s1592_s27 }
 0x169   : > { %p1589_p12 = pnand %p1587_p7, %p1573_p3  ;;  %p1595_p9 = scmp.lt.s32.totalorder %s1593_s25, %s1586_s29 }
 0x16b   : > { %p1590_p11 = pneg %p1589_p12  ;;  %p1596_p13 = por %p1595_p9, %p1594_p4 }
 0x16d   : > { %p1597_p6 = pnand %p1596_p13, %p1590_p11 }
 0x16f   : > { %1600 = shalt.err (!%p1597_p6)
}
 0x170   : > { %s3431_s20 = scalar_lea.sflag [#allocation12], %s3413_s12  ;;  %p3432_p4 = scmp.eq.s32.totalorder %s3332_s15, 0 }
 0x171   : > { %1131 = dma.hbm_to_vmem [thread:$0]  (!%p2750_p0), %s2771_s22, 128, %s2754_s6, %s3431_s20  }
 0x172   : > { %p3433_p11 = scmp.ne.s32.totalorder %s3421_s8, %s3424_s0  ;;  %p3434_p2 = scmp.eq.s32.totalorder %s2217_s23, 0 }
 0x173   : > { %p3435_p8 = scmp.ne.s32.totalorder %s3424_s0, %s3426_s26  ;;  %s265_s16 = ssub.s32 %s2759_s7, %s2762_s3 }
 0x174   : > { %p279_p3 = por %p3433_p11, %p3432_p4  ;;  %s506_s9 = sand.u32 1, %s3421_s8  }
 0x175   : > { %p2812_p10 = por %p3435_p8, %p3434_p2  ;;  %s267_s10 = sor.u32 %s265_s16, %s2244_s11 }
 0x176   : > { %s1048_s4 = sshll.u32 %s506_s9, 3  ;;  %p268_p5 = scmp.eq.s32.totalorder %s267_s10, 0 }
 0x177   : > { %s3436_s30 = scalar_select %p2812_p10, 1, 0 }
 0x178   : > { %s1090_s14 = scalar_select %p279_p3, [#allocation4], [#allocation26] }
 0x179   : > { %s3598_s8 = smov (!%p268_p5, %s3421_s8), %s270_s18  ;;  %s3437_s22 = sld [smem:[#allocation49_spill]] }
 0x17a   : > { %s3438_s0 = sld [smem:[#allocation51_spill]]  ;;  %s3600_s19 = smov (!%p279_p3, %s260_s19), 0 }
 0x17b   : > { %p3439_p0 = scmp.lt.s32.totalorder %s3332_s15, 4  ;;  %s3441_s26 = sld [smem:[#allocation50_spill]] }
 0x17c   : > { %s508_s3 = scalar_lea.vmem [#allocation16], %s1048_s4  ;;  %s294_s29 = sadd.s32 7, %s2223_s24 }
 0x17d   : > { %s3602_s14 = smov (!%p3439_p0, %s1090_s14), [#allocation34]  ;;  %p3440_p7 = pmov %p3439_p0 }
 0x17e   : > { %p3442_p12 = pmov %p3439_p0  ;;  %s520_s18 = sshll.u32 %s508_s3, 4  ;;  %s2846_s18 = int_to_ptr.vmem [resolvable:$true] %s520_s18 }
 0x17f   : > { %s3604_s19 = smov (!%p3440_p7, %s3600_s19), 0  ;;  %s2840_s28 = sld [smem:[#allocation4 + %s294_s29]] }
 0x180   : > { %p2833_p9 = pnand %p3442_p12, %p279_p3  ;;  %s511_s7 = sld [smem:[%s3602_s14 + %s3604_s19]] }
 0x181   : > { %s297_s27 = sadd.s32 7, %s2231_s21  ;;  %s3444_s19 = sld [smem:[#allocation95_spill]] }
 0x182   : > { %s2843_s20 = sld [smem:[#allocation4 + %s297_s27]]  ;;  %p1603_p11 = pneg %p2833_p9 }
 0x186   : > { %s1050_s25 = sshll.u32 %s511_s7, 1 }
 0x187   : > { %s516_s16 = sadd.s32 %s1977_s2, %s1050_s25  ;;  %s3445_s1 = smov %s3444_s19 }
 0x188   : > { %s1051_s9 = sshll.u32 %s516_s16, 7  ;;  %s1606_s3 = scalar_lea.hbm %s3445_s1, 6400 }
 0x189   : > { %s2853_s14 = scalar_lea.hbm %s3444_s19, %s1051_s9 }
 0x18a   : > { %s1601_s4 = scalar_lea.hbm %s2853_s14, 128  ;;  %p1607_p8 = scmp.lt.u32.totalorder %s2853_s14, %s3445_s1 }
 0x18b   : > { %p1602_p4 = scmp.ne.s32.totalorder %s2853_s14, %s1601_s4  ;;  %p1608_p5 = scmp.lt.u32.totalorder %s1606_s3, %s1601_s4 }
 0x18c   : > { %p1610_p7 = scmp.lt.u32.totalorder %s1601_s4, %s2853_s14 }
 0x18d   : > { %p1604_p3 = pnand %p1603_p11, %p1602_p4  ;;  %p1609_p0 = por %p1608_p5, %p1607_p8 }
 0x18f   : > { %p1605_p2 = pneg %p1604_p3  ;;  %p1611_p12 = por %p1610_p7, %p1609_p0 }
 0x191   : > { %p1612_p13 = pnand %p1611_p12, %p1605_p2 }
 0x193   : > { %1615 = shalt.err (!%p1612_p13)
}
 0x194   : > { %s1616_s25 = scalar_lea.vmem %s2846_s18, 128  ;;  %s1990_s16 = smov [#allocation16]  }
 0x195   : > { %p1617_p4 = scmp.ne.s32.totalorder %s2846_s18, %s1616_s25  ;;  %s1621_s9 = sshll.u32 %s1990_s16, 4  ;;  %s1622_s9 = int_to_ptr.vmem [resolvable:$false] %s1621_s9 }
 0x196   : > { %s1623_s10 = scalar_lea.vmem %s1622_s9, 256  ;;  %p1624_p10 = scmp.lt.s32.totalorder %s2846_s18, %s1622_s9 }
 0x197   : > { %p1619_p3 = pnand %p1617_p4, %p1603_p11  ;;  %p1625_p8 = scmp.lt.s32.totalorder %s1623_s10, %s1616_s25 }
 0x199   : > { %p1620_p6 = pneg %p1619_p3  ;;  %p1626_p5 = por %p1625_p8, %p1624_p10 }
 0x19b   : > { %p1627_p0 = pnand %p1626_p5, %p1620_p6 }
 0x19d   : > { %1630 = shalt.err (!%p1627_p0)
}
 0x19e   : > { %s3446_s19 = scalar_lea.sflag [#allocation15], %s3413_s12  ;;  %s304_s12 = sadd.s32 1, %s3438_s0 }
 0x19f   : > { %1141 = dma.hbm_to_vmem [thread:$0]  (!%p2833_p9), %s2853_s14, 128, %s2846_s18, %s3446_s19  }
 0x1a0   : > { %p3447_p10 = scmp.eq.s32.totalorder %s2217_s23, 0  ;;  %p3448_p13 = scmp.ne.s32.totalorder %s3437_s22, %s3441_s26 }
 0x1a1   : > { %s299_s4 = ssub.s32 %s2840_s28, %s2843_s20  ;;  %s527_s21 = sand.u32 1, %s3438_s0  }
 0x1a2   : > { %p2890_p6 = por %p3448_p13, %p3447_p10  ;;  %s301_s7 = sor.u32 %s299_s4, %s2244_s11 }
 0x1a3   : > { %p3450_p11 = scmp.eq.s32.totalorder %s3332_s15, 0  ;;  %p3451_p2 = scmp.ne.s32.totalorder %s3438_s0, %s3437_s22 }
 0x1a4   : > { %s3449_s6 = scalar_select %p2890_p6, 1, 0 }
 0x1a5   : > { %p313_p7 = por %p3451_p2, %p3450_p11  ;;  %p302_p12 = scmp.eq.s32.totalorder %s301_s7, 0 }
 0x1a6   : > { %s1052_s3 = sshll.u32 %s527_s21, 3  ;;  %p3452_p4 = scmp.lt.s32.totalorder %s3332_s15, 4 }
 0x1a7   : > { %s3606_s0 = smov (!%p302_p12, %s3438_s0), %s304_s12  ;;  %s3608_s29 = smov (!%p313_p7, %s294_s29), 0 }
 0x1a8   : > { %p2905_p3 = pnand %p3452_p4, %p313_p7  ;;  %p3454_p9 = pmov %p3452_p4 }
 0x1a9   : > { %s1093_s26 = scalar_select %p313_p7, [#allocation4], [#allocation27] }
 0x1aa   : > { %p3455_p8 = pmov %p3452_p4  ;;  %s531_s22 = scalar_lea.vmem [#allocation17], %s1052_s3 }
 0x1ab   : > { %s3610_s26 = smov (!%p3454_p9, %s1093_s26), [#allocation35]  ;;  %s543_s18 = sshll.u32 %s531_s22, 4  ;;  %s2919_s18 = int_to_ptr.vmem [resolvable:$true] %s543_s18 }
 0x1ac   : > { %s3612_s29 = smov (!%p3455_p8, %s3608_s29), 0  ;;  %s3456_s16 = sld [smem:[#allocation96_spill]] }
 0x1ad   : > { %s534_s11 = sld [smem:[%s3610_s26 + %s3612_s29]]  ;;  %s528_s24 = scalar_lea.sflag [#allocation18], %s527_s21 }
 0x1ae   : > { %p1633_p0 = pneg %p2905_p3 }
 0x1b2   : > { %s3457_s4 = smov %s3456_s16 }
 0x1b3   : > { %s1054_s28 = sshll.u32 %s534_s11, 1  ;;  %s1636_s12 = scalar_lea.hbm %s3457_s4, 6400 }
 0x1b4   : > { %s539_s20 = sadd.s32 %s1977_s2, %s1054_s28 }
 0x1b5   : > { %s1055_s14 = sshll.u32 %s539_s20, 7 }
 0x1b6   : > { %s2924_s9 = scalar_lea.hbm %s3456_s16, %s1055_s14 }
 0x1b7   : > { %s1631_s10 = scalar_lea.hbm %s2924_s9, 128  ;;  %p1637_p11 = scmp.lt.u32.totalorder %s2924_s9, %s3457_s4 }
 0x1b8   : > { %p1632_p5 = scmp.ne.s32.totalorder %s2924_s9, %s1631_s10  ;;  %p1638_p2 = scmp.lt.u32.totalorder %s1636_s12, %s1631_s10 }
 0x1b9   : > { %p1640_p12 = scmp.lt.u32.totalorder %s1631_s10, %s2924_s9 }
 0x1ba   : > { %p1634_p10 = pnand %p1633_p0, %p1632_p5  ;;  %p1639_p7 = por %p1638_p2, %p1637_p11 }
 0x1bc   : > { %p1635_p13 = pneg %p1634_p10  ;;  %p1641_p4 = por %p1640_p12, %p1639_p7 }
 0x1be   : > { %p1642_p9 = pnand %p1641_p4, %p1635_p13 }
 0x1c0   : > { %1645 = shalt.err (!%p1642_p9)
}
 0x1c1   : > { %s1646_s21 = scalar_lea.vmem %s2919_s18, 128  ;;  %s1991_s26 = smov [#allocation17]  }
 0x1c2   : > { %p1647_p8 = scmp.ne.s32.totalorder %s2919_s18, %s1646_s21  ;;  %s1651_s11 = sshll.u32 %s1991_s26, 4  ;;  %s1652_s11 = int_to_ptr.vmem [resolvable:$false] %s1651_s11 }
 0x1c3   : > { %s1653_s22 = scalar_lea.vmem %s1652_s11, 256  ;;  %p1654_p6 = scmp.lt.s32.totalorder %s2919_s18, %s1652_s11 }
 0x1c4   : > { %p1649_p5 = pnand %p1647_p8, %p1633_p0  ;;  %p1655_p11 = scmp.lt.s32.totalorder %s1653_s22, %s1646_s21 }
 0x1c6   : > { %p1650_p10 = pneg %p1649_p5  ;;  %p1656_p2 = por %p1655_p11, %p1654_p6 }
 0x1c8   : > { %p1657_p7 = pnand %p1656_p2, %p1650_p10 }
 0x1ca   : > { %1660 = shalt.err (!%p1657_p7)
}
 0x1cb   : > { %1146 = dma.hbm_to_vmem [thread:$0]  (!%p2905_p3), %s2924_s9, 128, %s2919_s18, %s528_s24  }
 0x1cc   : > { %s3458_s28 = sld [smem:[#allocation81_spill]] }
 0x1d2   : > { %p3459_p13 = scmp.ne.s32.totalorder %s3458_s28, 0 }
 0x1d3   : > { %s3460_s20 = sld [smem:[#allocation66_spill]] (!%p3459_p13)  ;;  %s554_s14 = sand.u32 (!%p3459_p13), 1, %s1957_s5  }
 0x1d4   : > { %552 = sbr.rel (%p3459_p13) target bundleno = 612 (0x264), region = 52  ;;  %s2954_s27 = sshll.u32 (!%p3459_p13), %s554_s14, 3 }
 0x1d5   : > { %s555_s25 = scalar_lea.sflag (!%p3459_p13), [#allocation6], %s554_s14  ;;  %s558_s16 = scalar_lea.vmem (!%p3459_p13), [#allocation5], %s2954_s27 }
 0x1d9   : > { %p3461_p0 = scmp.ne.s32.totalorder (!%p3459_p13), %s3460_s20, 0 }
 0x1db   : > { %1820 = dma.done.wait (%p3461_p0), %s555_s25, 128  }
 0x1dc   : > { %1822 = vsyncadd (%p3461_p0), %s555_s25, 4294967168  ;;  %s3462_s17 = sld [smem:[#allocation64_spill]]  ;;  %s3463_s10 = sld [smem:[#allocation75_spill]] }
 0x1dd   : > { %s563_s18 = sand.u32 1, %s2217_s23  }
 0x1de   : > { %s564_s29 = scalar_lea.sflag [#allocation9], %s563_s18 }
 0x1e2   : > { %s565_s9 = sand.u32 1, %s3462_s17   ;;  %p3464_p6 = scmp.ne.s32.totalorder %s3463_s10, 0 }
 0x1e3   : > { %s2963_s24 = sshll.u32 %s565_s9, 3 }
 0x1e4   : > { %s567_s19 = scalar_lea.vmem [#allocation8], %s2963_s24 }
 0x1e5   : > { %1824 = dma.done.wait (%p3464_p6), %s564_s29, 128  }
 0x1e6   : > { %1826 = vsyncadd (%p3464_p6), %s564_s29, 4294967168  ;;  %s3465_s12 = sld [smem:[#allocation62_spill]]  ;;  %s3466_s7 = sld [smem:[#allocation61_spill]] }
 0x1ec   : > { %s574_s3 = sand.u32 1, %s3465_s12   ;;  %p3467_p3 = scmp.ne.s32.totalorder %s3466_s7, 0 }
 0x1ed   : > { %s2971_s21 = sshll.u32 %s574_s3, 3 }
 0x1ee   : > { %s576_s26 = scalar_lea.vmem [#allocation10], %s2971_s21 }
 0x1ef   : > { %1828 = dma.done.wait (%p3467_p3), %s564_s29, 128  }
 0x1f0   : > { %1830 = vsyncadd (%p3467_p3), %s564_s29, 4294967168  ;;  %s3468_s23 = sld [smem:[#allocation82_spill]]  ;;  %s583_s11 = sand.u32 1, %s1921_s13  }
 0x1f1   : > { %s2979_s22 = sshll.u32 %s583_s11, 3  ;;  %s582_s28 = scalar_lea.sflag [#allocation12], %s563_s18 }
 0x1f6   : > { %p3469_p12 = scmp.ne.s32.totalorder %s3468_s23, 0 }
 0x1f8   : > { %1832 = dma.done.wait (%p3469_p12), %s582_s28, 128  }
 0x1f9   : > { %1834 = vsyncadd (%p3469_p12), %s582_s28, 4294967168  ;;  %s3470_s14 = sld [smem:[#allocation60_spill]] }
 0x1ff   : > { %s592_s17 = sand.u32 1, %s3470_s14  }
 0x200   : > { %s2987_s10 = sshll.u32 %s592_s17, 3 }
 0x201   : > { %1836 = dma.done.wait (%p2723_p1), %s582_s28, 128  }
 0x202   : > { %1838 = vsyncadd (%p2723_p1), %s582_s28, 4294967168  ;;  %s3472_s29 = sld [smem:[#allocation59_spill]]  ;;  %s3473_s12 = sld [smem:[#allocation84_spill]] }
 0x203   : > { %s600_s23 = scalar_lea.sflag [#allocation15], %s563_s18 }
 0x208   : > { %s601_s7 = sand.u32 1, %s3472_s29   ;;  %p3474_p4 = scmp.ne.s32.totalorder %s3473_s12, 0 }
 0x209   : > { %s2995_s3 = sshll.u32 %s601_s7, 3 }
 0x20a   : > { %s603_s11 = scalar_lea.vmem [#allocation14], %s2995_s3 }
 0x20b   : > { %1840 = dma.done.wait (%p3474_p4), %s600_s23, 128  }
 0x20c   : > { %1842 = vsyncadd (%p3474_p4), %s600_s23, 4294967168  ;;  %s3475_s14 = sld [smem:[#allocation58_spill]]  ;;  %p3476_p9 = scmp.ne.s32.totalorder %s3436_s30, 0 }
 0x212   : > { %s610_s17 = sand.u32 1, %s3475_s14  }
 0x213   : > { %s1063_s9 = sshll.u32 %s610_s17, 3 }
 0x214   : > { %s612_s20 = scalar_lea.vmem [#allocation16], %s1063_s9 }
 0x215   : > { %1844 = dma.done.wait (%p3476_p9), %s600_s23, 128  }
 0x216   : > { %1846 = vsyncadd (%p3476_p9), %s600_s23, 4294967168  ;;  %s3477_s28 = sld [smem:[#allocation49_spill]]  ;;  %p3478_p1 = scmp.ne.s32.totalorder %s3449_s6, 0 }
 0x21c   : > { %s617_s25 = sand.u32 1, %s3477_s28  }
 0x21d   : > { %s1064_s18 = sshll.u32 %s617_s25, 3  ;;  %s618_s29 = scalar_lea.sflag [#allocation18], %s617_s25 }
 0x21e   : > { %s621_s7 = scalar_lea.vmem [#allocation17], %s1064_s18 }
 0x21f   : > { %1848 = dma.done.wait (%p3478_p1), %s618_s29, 128  }
 0x220   : > { %1850 = vsyncadd (%p3478_p1), %s618_s29, 4294967168  ;;  %s3479_s12 = sld [smem:[#allocation47_spill]]  ;;  %s3480_s23 = sld [smem:[#allocation68_spill]] }
 0x226   : > { %s686_s3 = sand.u32 1, %s3479_s12   ;;  %p1066_p8 = scmp.ne.s32.totalorder %s3480_s23, 0 }
 0x227   : > { %s3015_s9 = sshll.u32 %s686_s3, 3  ;;  %v1992_v0 = vmov (!%p1066_p8), 0.0  }
 0x228   : > { %s688_s30 = scalar_lea.vmem [#allocation19], %s3015_s9  ;;  %715 = sbr.rel (%p1066_p8) target bundleno = 559 (0x22f), region = 88  ;;  %716 = vst [vmem:[#allocation2] sm:$0xff] (!%p1066_p8), %v1992_v0 }
 0x22f PF: > { %v717_v1 = vld [vmem:[%s558_s16] sm:$0xff]  ;;  %v718_v2 = vld [vmem:[%s567_s19] sm:$0xff]  ;;  %s3481_s6 = scalar_lea.vmem [#allocation11], %s2979_s22  ;;  %s3482_s14 = scalar_lea.vmem [#allocation13], %s2987_s10 }
 0x230   : > { %v720_v3 = vld [vmem:[%s576_s26] sm:$0xff]  ;;  %v719_v4 = vadd.f32 %v718_v2, %v717_v1  ;;  %v722_v5 = vld [vmem:[%s3481_s6] sm:$0xff]  ;;  %s3483_s27 = sld [smem:[#allocation68_spill]] }
 0x231   : > { %v724_v7 = vld [vmem:[%s3482_s14] sm:$0xff]  ;;  %v726_v9 = vld [vmem:[%s603_s11] sm:$0xff] }
 0x232   : > { %v721_v6 = vadd.f32 %v720_v3, %v719_v4  ;;  %v728_v11 = vld [vmem:[%s612_s20] sm:$0xff]  ;;  %v730_v13 = vld [vmem:[%s621_s7] sm:$0xff] }
 0x233   : > { %v732_v15 = vld [vmem:[#allocation2] sm:$0xff] }
 0x234   : > { %v723_v8 = vadd.f32 %v722_v5, %v721_v6 }
 0x236   : > { %v725_v10 = vadd.f32 %v724_v7, %v723_v8  ;;  %p1067_p5 = scmp.ne.s32.totalorder %s3483_s27, 1 }
 0x238   : > { %v727_v12 = vadd.f32 %v726_v9, %v725_v10 }
 0x23a   : > { %v729_v14 = vadd.f32 %v728_v11, %v727_v12  ;;  %738 = sbr.rel (%p1067_p5) target bundleno = 585 (0x249), region = 92 }
 0x23c   : > { %v731_v16 = vadd.f32 %v730_v13, %v729_v14 }
 0x23e   : > { %v733_v17 = vadd.f32 %v732_v15, %v731_v16 }
 0x240   : > { %734 = vst [vmem:[#allocation2] sm:$0xff] %v733_v17 }
 0x247   : > { %v739_v18 = vld [vmem:[#allocation2] sm:$0xff] }
 0x248   : > { %740 = vst [vmem:[%s688_s30] sm:$0xff] %v739_v18 }
 0x249 PF: > { %s3484_s16 = sld [smem:[#allocation69_spill]]  ;;  %s3486_s19 = sld [smem:[#allocation77_spill]] }
 0x24a   : > { %s3487_s20 = sld [smem:[#allocation97_spill]]  ;;  %s755_s11 = sshll.u32 %s688_s30, 4  ;;  %s756_s11 = int_to_ptr.vmem [resolvable:$true] %s755_s11 }
 0x24b   : > { %s742_s28 = scalar_lea.sflag [#allocation7], %s686_s3  ;;  %s1661_s25 = scalar_lea.vmem %s756_s11, 128 }
 0x24c   : > { %p1662_p10 = scmp.ne.s32.totalorder %s756_s11, %s1661_s25  ;;  %s1993_s18 = smov [#allocation19]  }
 0x24d   : > { %s1665_s29 = sshll.u32 %s1993_s18, 4  ;;  %s1666_s29 = int_to_ptr.vmem [resolvable:$false] %s1665_s29 }
 0x24e   : > { %s1667_s7 = scalar_lea.vmem %s1666_s29, 256  ;;  %p1668_p13 = scmp.lt.s32.totalorder %s756_s11, %s1666_s29 }
 0x24f   : > { %s1069_s21 = sshll.u32 %s3484_s16, 7  ;;  %p3489_p11 = scmp.ne.s32.totalorder %s3486_s19, 0 }
 0x250   : > { %s3488_s17 = smov %s3487_s20  ;;  %s3036_s10 = scalar_lea.hbm %s3487_s20, %s1069_s21 }
 0x251   : > { %p1663_p2 = pnand %p1662_p10, %p3489_p11  ;;  %p1669_p0 = scmp.lt.s32.totalorder %s1667_s7, %s1661_s25 }
 0x253   : > { %p1664_p7 = pneg %p1663_p2  ;;  %p1670_p6 = por %p1669_p0, %p1668_p13 }
 0x255   : > { %p1671_p3 = pnand %p1670_p6, %p1664_p7 }
 0x257   : > { %1674 = shalt.err (!%p1671_p3)
}
 0x258   : > { %s1675_s12 = scalar_lea.hbm %s3036_s10, 128  ;;  %s1679_s30 = scalar_lea.hbm %s3488_s17, 256 }
 0x259   : > { %p1676_p12 = scmp.ne.s32.totalorder %s3036_s10, %s1675_s12  ;;  %p1680_p1 = scmp.lt.u32.totalorder %s3036_s10, %s3488_s17 }
 0x25a   : > { %p1681_p8 = scmp.lt.u32.totalorder %s1679_s30, %s1675_s12  ;;  %p1683_p10 = scmp.lt.u32.totalorder %s1675_s12, %s3036_s10 }
 0x25b   : > { %p1677_p4 = pnand %p1676_p12, %p3489_p11 }
 0x25c   : > { %p1682_p5 = por %p1681_p8, %p1680_p1 }
 0x25d   : > { %p1678_p9 = pneg %p1677_p4 }
 0x25e   : > { %p1684_p2 = por %p1683_p10, %p1682_p5 }
 0x260   : > { %p1685_p7 = pnand %p1684_p2, %p1678_p9 }
 0x262   : > { %1688 = shalt.err (!%p1685_p7)
}
 0x263   : > { %1104 = dma.vmem_to_hbm [thread:$0]  (%p3489_p11), %s756_s11, 128, %s3036_s10, %s742_s28  }
 0x264 PF: > { %s3490_s14 = sld [smem:[#allocation46_spill]]  ;;  %s3491_s27 = sld [smem:[#allocation79_spill]] }
 0x265   : > { %p1152_p13 = scmp.ge.s32.totalorder %s3332_s15, 2 }
 0x26a   : > { %s767_s16 = sand.u32 1, %s3490_s14   ;;  %p3492_p0 = scmp.ne.s32.totalorder %s3491_s27, 0 }
 0x26b   : > { %s768_s24 = scalar_lea.sflag [#allocation7], %s767_s16 }
 0x26c   : > { %p1148_p6 = pnand %p1152_p13, %p3492_p0 }
 0x26e   : > { %1852 = dma.done.wait (!%p1148_p6), %s768_s24, 128  }
 0x26f   : > { %1854 = vsyncadd (!%p1148_p6), %s768_s24, 4294967168  ;;  %s3254_s18 = sadd.s32 1, %s3332_s15   ;;  %s3493_s19 = sld [smem:[#allocation47_spill]] }
 0x270   : > { %s3494_s20 = sld [smem:[#allocation48_spill]]  ;;  %s3495_s21 = sld [smem:[#allocation76_spill]] }
 0x271   : > { %s3496_s26 = sld [smem:[#allocation49_spill]]  ;;  %s3497_s22 = sld [smem:[#allocation51_spill]] }
 0x272   : > { %s3498_s10 = smov %s3606_s0  ;;  %s3499_s24 = sld [smem:[#allocation58_spill]] }
 0x273   : > { %s3500_s25 = sld [smem:[#allocation53_spill]]  ;;  %s3501_s27 = sld [smem:[#allocation59_spill]] }
 0x274   : > { %s3502_s28 = sld [smem:[#allocation54_spill]]  ;;  %s3503_s29 = sld [smem:[#allocation85_spill]] }
 0x275   : > { %s3504_s30 = sld [smem:[#allocation60_spill]]  ;;  %s3505_s11 = sld [smem:[#allocation56_spill]] }
 0x276   : > { %s3506_s7 = sld [smem:[#allocation88_spill]]  ;;  %p3066_p11 = scmp.ge.s32.totalorder %s3254_s18, 6  }
 0x277   : > { %s3510_s9 = sld [smem:[#allocation57_spill]]  ;;  %s3512_s0 = smov %s3495_s21 }
 0x278   : > { %s3507_s12 = scalar_select %p3066_p11, 1, 0 }
 0x279   : > { %s3511_s14 = sld [smem:[#allocation83_spill]]  ;;  %s3513_s6 = sld [smem:[#allocation62_spill]] }
 0x27a   : > { %3508 = sst [smem:[#allocation56_spill]] %s3507_s12  ;;  %s3514_s21 = smov %s3496_s26 }
 0x27b   : > { %s3515_s16 = sld [smem:[#allocation63_spill]]  ;;  %s3516_s1 = sld [smem:[#allocation87_spill]] }
 0x27c   : > { %s3517_s23 = smov %s3498_s10  ;;  %s3518_s18 = sld [smem:[#allocation64_spill]] }
 0x27d   : > { %3519 = sst [smem:[#allocation46_spill]] %s3499_s24  ;;  %s3520_s4 = sld [smem:[#allocation65_spill]] }
 0x27e   : > { %3521 = sst [smem:[#allocation47_spill]] %s3500_s25  ;;  %s3522_s17 = sld [smem:[#allocation78_spill]] }
 0x27f   : > { %s3523_s26 = smov %s3598_s8  ;;  %3524 = sst [smem:[#allocation48_spill]] %s3501_s27 }
 0x280   : > { %s3525_s3 = sld [smem:[#allocation67_spill]]  ;;  %s3526_s2 = sld [smem:[#allocation86_spill]] }
 0x281   : > { %s3527_s15 = sld [smem:[#allocation70_spill]]  ;;  %s3528_s12 = sld [smem:[#allocation71_spill]] }
 0x282   : > { %s3529_s10 = smov %s3505_s11  ;;  %s3530_s24 = sld [smem:[#allocation73_spill]] }
 0x283   : > { %s3531_s11 = smov %s3506_s7  ;;  %s3532_s25 = sld [smem:[#allocation74_spill]] }
 0x284   : > { %3533 = sst [smem:[#allocation49_spill]] %s1921_s13  ;;  %s3534_s8 = sld [smem:[#allocation72_spill]] }
 0x285   : > { %s3535_s13 = smov %s3510_s9  ;;  %3537 = sst [smem:[#allocation50_spill]] %s3513_s6 }
 0x286   : > { %3538 = sst [smem:[#allocation51_spill]] %s3516_s1  ;;  %s3540_s9 = smov %s3520_s4 }
 0x287   : > { %3539 = sst [smem:[#allocation52_spill]] %s3518_s18  ;;  %s3542_s7 = smov %s1957_s5 }
 0x288   : > { %3541 = sst [smem:[#allocation53_spill]] %s3522_s17  ;;  %s3543_s5 = smov %s3525_s3 }
 0x289   : > { %3544 = sst [smem:[#allocation54_spill]] %s3526_s2  ;;  %s3546_s6 = smov %s3528_s12 }
 0x28a   : > { %3545 = sst [smem:[#allocation55_spill]] %s3527_s15  ;;  %s3548_s2 = smov %s3532_s25 }
 0x28b   : > { %3547 = sst [smem:[#allocation56_spill]] %s3530_s24  ;;  %s3549_s1 = sadd.s32 1, %s3534_s8  }
 0x28c   : > { %3550 = sst [smem:[#allocation57_spill]] %s3549_s1  ;;  %40 = sbr.rel (!%p3066_p11) target bundleno = 50 (0x32), region = 190 }
 0x293   :  { %773 = vsyncpa [#allocation6], 1 }
 0x294   :  { %775 = vsyncpa [#allocation6 + $0x1], 1 }
 0x295   :  { %776 = vsyncpa [#allocation9], 1 }
 0x296   :  { %778 = vsyncpa [#allocation9 + $0x1], 1 }
 0x297   :  { %779 = vsyncpa [#allocation12], 1 }
 0x298   :  { %781 = vsyncpa [#allocation12 + $0x1], 1 }
 0x299   :  { %782 = vsyncpa [#allocation15], 1 }
 0x29a   :  { %784 = vsyncpa [#allocation15 + $0x1], 1 }
 0x29b   :  { %785 = vsyncpa [#allocation18], 1 }
 0x29c   :  { %787 = vsyncpa [#allocation18 + $0x1], 1 }
 0x29d   :  { %788 = vsyncpa [#allocation7], 1 }
 0x29e   :  { %790 = vsyncpa [#allocation7 + $0x1], 1 }

</bundles_post_ra>
